<compile_context>
chip_gen: v5e
topology: v5e:2x2
jax: 0.10.0
libtpu: 0.0.40
codegen_flags: <defaults>
</compile_context>

<pallas_src>
import functools

import jax
import jax.numpy as jnp
from jax.experimental import pallas as pl
from jax.experimental.pallas import tpu as pltpu


def _round_up(x, m):
    return ((x + m - 1) // m) * m


def _pad2(a, rows, cols):
    return jnp.pad(a, ((0, rows - a.shape[0]), (0, cols - a.shape[1])))


def _vmem_budget_bytes():
    """Generation-aware VMEM budget: ~3/4 of physical, capped at 100 MiB.

    v7x (64 MiB physical) -> ~48 MiB;  v5e/v6e (128 MiB) -> 96 MiB.
    """
    cap = 64 * 1024 * 1024  # conservative default (v7x-sized)
    try:
        info = pltpu.get_tpu_info()
        cap = int(getattr(info, "vmem_capacity_bytes", cap))
    except Exception:
        pass
    return min(cap * 3 // 4, 100 * 1024 * 1024)


def _estimate_vmem_bytes(tm, tk, Np, Hp, Op, xw_resident):
    """Rough per-core VMEM footprint, assuming default double-buffering."""
    a_blk = 2 * (tm * tk * 2)                              # bf16 A stripes
    xw_blk = 2 * ((Np if xw_resident else tk) * Hp * 2)    # bf16 XW
    w_blk = 2 * (Hp * Hp * 2 + Hp * Op * 2)                # bf16 W1 / W2
    vec_blk = 2 * (4 * Hp + Op) * 4                        # biases, gamma, beta
    out_blk = 2 * (tm * Hp * 4 + tm * Op * 4)              # emb / logp tiles
    acc_blk = tm * Hp * 4                                  # f32 accumulator
    return a_blk + xw_blk + w_blk + vec_blk + out_blk + acc_blk


def _choose_tiles(N, tile_rows, tile_cols):
    """Pick row tile tm, K-stripe tk and padded node count Np."""
    Np0 = _round_up(max(N, 1), 128)
    tm = min(tile_rows, Np0)
    # v7x megacore: keep >= 2 row tiles on the "parallel" axis when possible.
    if Np0 // tm < 2 and Np0 >= 256:
        tm = _round_up(Np0 // 2, 128)
    Np = _round_up(N, tm)
    tk = min(tile_cols, Np)
    while Np % tk != 0:        # Np is a multiple of 128, so this terminates
        tk -= 128
    return tm, tk, Np


def gnn_kernel(a_ref, xw_ref, bg_ref, gamma_ref, beta_ref,
               w1_ref, b1_ref, w2_ref, b2_ref,
               emb_ref, out_ref, acc_ref,
               *, valid_h, valid_o, tk, xw_resident):
    """Grid = (row tiles, K stripes).  acc_ref accumulates A_tile @ XW_stripe."""
    k = pl.program_id(1)

    # --- init accumulator at first K stripe ---
    @pl.when(k == 0)
    def _():
        acc_ref[...] = jnp.zeros_like(acc_ref)

    # --- GCN aggregation: bf16 operands, f32 accumulation on the MXU ---
    if xw_resident:
        # XW lives whole in VMEM; slice the current K stripe locally
        # (no per-row-tile HBM re-stream).
        start = pl.multiple_of(k * tk, 128)
        xw_blk = xw_ref[pl.ds(start, tk), :]
    else:
        xw_blk = xw_ref[...]
    acc_ref[...] += jnp.dot(a_ref[...], xw_blk,
                            preferred_element_type=jnp.float32)

    # --- epilogue: bias, ReLU, LayerNorm, post_mp, log_softmax ---
    @pl.when(k == pl.num_programs(1) - 1)
    def _():
        hp = acc_ref.shape[-1]          # padded hidden width (multiple of 128)
        op = out_ref.shape[-1]          # padded output width (multiple of 128)

        hmask = (jax.lax.broadcasted_iota(jnp.int32, (1, hp), 1)
                 < valid_h).astype(jnp.float32)

        h = acc_ref[...] + bg_ref[...]
        h = jnp.maximum(h, 0.0)
        # Dropout(p=0.25): identity in eval mode.
        h = h * hmask                   # keep pad lanes exactly zero

        # LayerNorm over the *true* hidden dim (exclude pad lanes).
        inv_h = jnp.float32(1.0 / valid_h)
        mean = jnp.sum(h, axis=-1, keepdims=True) * inv_h
        centered = (h - mean) * hmask
        var = jnp.sum(centered * centered, axis=-1, keepdims=True) * inv_h
        hn = centered * jax.lax.rsqrt(var + 1e-5)
        hn = hn * gamma_ref[...] + beta_ref[...]   # gamma/beta pad lanes are 0
        emb_ref[...] = hn

        # post_mp: Linear -> Dropout(eval: identity) -> Linear.
        # bf16 operands (single-pass MXU), f32 accumulation; logits stay f32.
        hn_b = hn.astype(jnp.bfloat16)
        z = jnp.dot(hn_b, w1_ref[...],
                    preferred_element_type=jnp.float32) + b1_ref[...]
        z = jnp.dot(z.astype(jnp.bfloat16), w2_ref[...],
                    preferred_element_type=jnp.float32) + b2_ref[...]

        # log_softmax over the *true* output dim (mask pad logits).
        omask = jax.lax.broadcasted_iota(jnp.int32, (1, op), 1) < valid_o
        z = jnp.where(omask, z, jnp.float32(-1e30))
        m = jnp.max(z, axis=-1, keepdims=True)
        shifted = z - m
        lse = jnp.log(jnp.sum(jnp.exp(shifted), axis=-1, keepdims=True))
        out_ref[...] = shifted - lse


def gnnmsa_forward(a_hat, x, params, *, tile_rows=512, tile_cols=1024):
    N = x.shape[0]
    H = params["w_gcn"].shape[1]
    O = params["w2"].shape[1]

    # Lane-dense padded widths and row / K tiles.
    Hp = _round_up(H, 128)
    Op = _round_up(O, 128)
    tm, tk, Np = _choose_tiles(N, tile_rows, tile_cols)

    # Generation-aware VMEM budget; keep XW resident only if it fits.
    vmem_budget = _vmem_budget_bytes()
    xw_resident = (_estimate_vmem_bytes(tm, tk, Np, Hp, Op, True)
                   <= int(vmem_budget * 0.8))

    # Hoist X @ W_gcn out of the kernel; cast A and XW to bf16 for the MXU.
    xw = jnp.dot(x, params["w_gcn"], preferred_element_type=jnp.float32)
    a_p = _pad2(a_hat, Np, Np).astype(jnp.bfloat16)
    xw_p = _pad2(xw, Np, Hp).astype(jnp.bfloat16)

    bg_p = _pad2(params["b_gcn"], 1, Hp)
    gamma_p = _pad2(params["ln_gamma"], 1, Hp)
    beta_p = _pad2(params["ln_beta"], 1, Hp)
    w1_p = _pad2(params["w1"], Hp, Hp).astype(jnp.bfloat16)
    b1_p = _pad2(params["b1"], 1, Hp)
    w2_p = _pad2(params["w2"], Hp, Op).astype(jnp.bfloat16)
    b2_p = _pad2(params["b2"], 1, Op)

    grid = (Np // tm, Np // tk)

    resident = lambda shape: pl.BlockSpec(shape, lambda i, k: (0, 0))
    if xw_resident:
        xw_spec = resident((Np, Hp))                     # single DMA, stays in VMEM
    else:
        xw_spec = pl.BlockSpec((tk, Hp), lambda i, k: (k, 0))  # streamed stripe

    in_specs = [
        # A row/col stripe.  Default Buffered(2) is enough: kernel is
        # bandwidth-bound, not latency-bound (deepen only if a profile shows
        # exposed DMA waits around the epilogue iterations).
        pl.BlockSpec((tm, tk), lambda i, k: (i, k)),
        xw_spec,                                         # XW
        resident((1, Hp)),                               # b_gcn
        resident((1, Hp)),                               # ln gamma
        resident((1, Hp)),                               # ln beta
        resident((Hp, Hp)),                              # w1 (bf16)
        resident((1, Hp)),                               # b1
        resident((Hp, Op)),                              # w2 (bf16)
        resident((1, Op)),                               # b2
    ]
    out_specs = (
        pl.BlockSpec((tm, Hp), lambda i, k: (i, 0)),     # emb (resident across k)
        pl.BlockSpec((tm, Op), lambda i, k: (i, 0)),     # log_softmax
    )

    # HBM traffic estimate reflects the shipped XW path (resident vs re-stream).
    xw_stream_bytes = Np * Hp * 2 if xw_resident else (Np // tm) * Np * Hp * 2
    cost = pl.CostEstimate(
        flops=2 * Np * Np * Hp + 2 * Np * Hp * Hp + 2 * Np * Hp * Op,
        transcendentals=Np * (Op + 2),
        bytes_accessed=(Np * Np * 2                       # bf16 A
                        + xw_stream_bytes                 # bf16 XW
                        + Hp * Hp * 2 + Hp * Op * 2       # bf16 weights
                        + (4 * Hp + Op) * 4               # small vectors
                        + Np * Hp * 4 + Np * Op * 4),     # f32 outputs
    )

    emb_p, out_p = pl.pallas_call(
        functools.partial(gnn_kernel, valid_h=H, valid_o=O,
                          tk=tk, xw_resident=xw_resident),
        grid=grid,
        in_specs=in_specs,
        out_specs=out_specs,
        out_shape=(
            jax.ShapeDtypeStruct((Np, Hp), jnp.float32),   # emb (padded)
            jax.ShapeDtypeStruct((Np, Op), jnp.float32),   # log_softmax (padded)
        ),
        scratch_shapes=[pltpu.VMEM((tm, Hp), jnp.float32)],
        compiler_params=pltpu.CompilerParams(
            dimension_semantics=("parallel", "arbitrary"),
            vmem_limit_bytes=int(vmem_budget),
        ),
        cost_estimate=cost,
    )(a_p, xw_p, bg_p, gamma_p, beta_p, w1_p, b1_p, w2_p, b2_p)

    return emb_p[:N, :H], out_p[:N, :O]


def build_gcn_norm_adjacency(edge_index, num_nodes):
    """Dense  D^-1/2 (A + I) D^-1/2  with A[target, source] = 1 per edge."""
    src, dst = edge_index[0], edge_index[1]
    a = jnp.zeros((num_nodes, num_nodes), jnp.float32)
    a = a.at[dst, src].set(1.0)                     # message flows source -> target
    a = a + jnp.eye(num_nodes, dtype=jnp.float32)   # self loops
    deg = jnp.sum(a, axis=1)
    d_inv_sqrt = jnp.where(deg > 0, 1.0 / jnp.sqrt(deg), 0.0)
    return d_inv_sqrt[:, None] * a * d_inv_sqrt[None, :]


def init_params(key, input_dim, hidden_dim, output_dim):
    ks = jax.random.split(key, 6)
    scale = lambda fan_in: 1.0 / jnp.sqrt(jnp.float32(fan_in))
    return {
        "w_gcn": jax.random.normal(ks[0], (input_dim, hidden_dim), jnp.float32) * scale(input_dim),
        "b_gcn": jnp.zeros((1, hidden_dim), jnp.float32),
        "ln_gamma": jnp.ones((1, hidden_dim), jnp.float32),
        "ln_beta": jnp.zeros((1, hidden_dim), jnp.float32),
        "w1": jax.random.normal(ks[1], (hidden_dim, hidden_dim), jnp.float32) * scale(hidden_dim),
        "b1": jax.random.normal(ks[2], (1, hidden_dim), jnp.float32) * 0.01,
        "w2": jax.random.normal(ks[3], (hidden_dim, output_dim), jnp.float32) * scale(hidden_dim),
        "b2": jax.random.normal(ks[4], (1, output_dim), jnp.float32) * 0.01,
    }


def reference_forward(a_hat, x, p):
    # Mirrors the kernel's bf16 quantization points with f32 accumulation.
    xw = jnp.dot(x, p["w_gcn"], preferred_element_type=jnp.float32).astype(jnp.bfloat16)
    a = a_hat.astype(jnp.bfloat16)
    h = jnp.dot(a, xw, preferred_element_type=jnp.float32) + p["b_gcn"]
    h = jnp.maximum(h, 0.0)
    mean = jnp.mean(h, axis=-1, keepdims=True)
    var = jnp.mean((h - mean) ** 2, axis=-1, keepdims=True)
    hn = (h - mean) * jax.lax.rsqrt(var + 1e-5) * p["ln_gamma"] + p["ln_beta"]
    z = jnp.dot(hn.astype(jnp.bfloat16), p["w1"].astype(jnp.bfloat16),
                preferred_element_type=jnp.float32) + p["b1"]
    z = jnp.dot(z.astype(jnp.bfloat16), p["w2"].astype(jnp.bfloat16),
                preferred_element_type=jnp.float32) + p["b2"]
    return hn, jax.nn.log_softmax(z, axis=1)


if __name__ == "__main__":
    key = jax.random.PRNGKey(0)

    # (N, E, input_dim, hidden_dim, output_dim, tile_rows, tile_cols)
    configs = [
        (16, 40, 8, 32, 4, 512, 1024),      # tiny graph: single-tile path
        (300, 1200, 16, 64, 7, 256, 256),   # multi row-tile + multi K-stripe path
    ]

    for cfg_idx, (N, E, fi, hd, od, tr, tc) in enumerate(configs):
        k_x, k_e, k_p, key = jax.random.split(key, 4)
        x = jax.random.normal(k_x, (N, fi), jnp.float32)
        edge_index = jax.random.randint(k_e, (2, E), 0, N)

        a_hat = build_gcn_norm_adjacency(edge_index, N)
        params = init_params(k_p, fi, hd, od)

        emb, logp = gnnmsa_forward(a_hat, x, params, tile_rows=tr, tile_cols=tc)
        jax.block_until_ready((emb, logp))

        emb_ref, logp_ref = reference_forward(a_hat, x, params)
        assert jnp.allclose(emb, emb_ref, atol=1e-3, rtol=1e-3), f"emb mismatch (config {cfg_idx})"
        assert jnp.allclose(logp, logp_ref, atol=3e-3, rtol=3e-3), f"logp mismatch (config {cfg_idx})"

    print("KERNEL_OK")
</pallas_src>

<mosaic_0001>
module attributes {stable_mosaic.version = 11 : i64} {
  func.func @gnn_kernel(%arg0: i32, %arg1: i32, %arg2: memref<128x128xbf16, #tpu.memory_space<vmem>>, %arg3: memref<128x128xbf16, #tpu.memory_space<vmem>>, %arg4: memref<1x128xf32, #tpu.memory_space<vmem>>, %arg5: memref<1x128xf32, #tpu.memory_space<vmem>>, %arg6: memref<1x128xf32, #tpu.memory_space<vmem>>, %arg7: memref<128x128xbf16, #tpu.memory_space<vmem>>, %arg8: memref<1x128xf32, #tpu.memory_space<vmem>>, %arg9: memref<128x128xbf16, #tpu.memory_space<vmem>>, %arg10: memref<1x128xf32, #tpu.memory_space<vmem>>, %arg11: memref<128x128xf32, #tpu.memory_space<vmem>>, %arg12: memref<128x128xf32, #tpu.memory_space<vmem>>, %arg13: memref<128x128xf32, #tpu.memory_space<vmem>>) attributes {dimension_semantics = [#tpu.dimension_semantics<parallel>, #tpu.dimension_semantics<arbitrary>], iteration_bounds = array<i64: 1, 1>, scalar_prefetch = 0 : i64, scratch_operands = 1 : i64, tpu.core_type = #tpu.core_type<tc>, window_params = [{transform_indices = @transform_0, window_bounds = array<i64: 128, 128>}, {pipeline_mode = #tpu.pipeline_mode<synchronous>, transform_indices = @transform_1, window_bounds = array<i64: 128, 128>}, {pipeline_mode = #tpu.pipeline_mode<synchronous>, transform_indices = @transform_2, window_bounds = array<i64: 1, 128>}, {pipeline_mode = #tpu.pipeline_mode<synchronous>, transform_indices = @transform_3, window_bounds = array<i64: 1, 128>}, {pipeline_mode = #tpu.pipeline_mode<synchronous>, transform_indices = @transform_4, window_bounds = array<i64: 1, 128>}, {pipeline_mode = #tpu.pipeline_mode<synchronous>, transform_indices = @transform_5, window_bounds = array<i64: 128, 128>}, {pipeline_mode = #tpu.pipeline_mode<synchronous>, transform_indices = @transform_6, window_bounds = array<i64: 1, 128>}, {pipeline_mode = #tpu.pipeline_mode<synchronous>, transform_indices = @transform_7, window_bounds = array<i64: 128, 128>}, {pipeline_mode = #tpu.pipeline_mode<synchronous>, transform_indices = @transform_8, window_bounds = array<i64: 1, 128>}, {transform_indices = @transform_9, window_bounds = array<i64: 128, 128>}, {transform_indices = @transform_10, window_bounds = array<i64: 128, 128>}]} {
    %c0_i32 = arith.constant 0 : i32
    %0 = arith.cmpi eq, %arg1, %c0_i32 : i32
    %1 = arith.extui %0 : i1 to i32
    %c0_i32_0 = arith.constant 0 : i32
    %2 = arith.cmpi ne, %1, %c0_i32_0 : i32
    scf.if %2 {
      %cst_9 = arith.constant 0.000000e+00 : f32
      %15 = vector.broadcast %cst_9 : f32 to vector<128x128xf32>
      %c0_10 = arith.constant 0 : index
      %c0_11 = arith.constant 0 : index
      %16 = vector.load %arg13[%c0_10, %c0_11] : memref<128x128xf32, #tpu.memory_space<vmem>>, vector<128x128xf32>
      tpu.vector_store %arg13[%c0_10, %c0_11], %15 {strides = array<i32>} : memref<128x128xf32, #tpu.memory_space<vmem>>, vector<128x128xf32>,
    } else {
    }
    %c128_i32 = arith.constant 128 : i32
    %3 = arith.muli %arg1, %c128_i32 : i32
    %4 = tpu.assume_multiple %3, 128 : i32
    %5 = arith.index_cast %4 : i32 to index
    %c0 = arith.constant 0 : index
    %6 = vector.load %arg3[%5, %c0] : memref<128x128xbf16, #tpu.memory_space<vmem>>, vector<128x128xbf16>
    %c0_1 = arith.constant 0 : index
    %c0_2 = arith.constant 0 : index
    %7 = vector.load %arg13[%c0_1, %c0_2] : memref<128x128xf32, #tpu.memory_space<vmem>>, vector<128x128xf32>
    %c0_3 = arith.constant 0 : index
    %c0_4 = arith.constant 0 : index
    %8 = vector.load %arg2[%c0_3, %c0_4] : memref<128x128xbf16, #tpu.memory_space<vmem>>, vector<128x128xbf16>
    %cst = arith.constant dense<0.000000e+00> : vector<128x128xf32>
    %9 = tpu.matmul %8, %6, %cst {dimension_numbers = #tpu.dot_dimension_numbers<[1], [0], [0], [1], [0, 0, 1, 1], [], []>} : vector<128x128xbf16>, vector<128x128xbf16>, vector<128x128xf32> -> vector<128x128xf32>
    %10 = arith.addf %7, %9 : vector<128x128xf32>
    %c0_5 = arith.constant 0 : index
    %c0_6 = arith.constant 0 : index
    %11 = vector.load %arg13[%c0_5, %c0_6] : memref<128x128xf32, #tpu.memory_space<vmem>>, vector<128x128xf32>
    tpu.vector_store %arg13[%c0_5, %c0_6], %10 {strides = array<i32>} : memref<128x128xf32, #tpu.memory_space<vmem>>, vector<128x128xf32>,
    %c0_i32_7 = arith.constant 0 : i32
    %12 = arith.cmpi eq, %arg1, %c0_i32_7 : i32
    %13 = arith.extui %12 : i1 to i32
    %c0_i32_8 = arith.constant 0 : i32
    %14 = arith.cmpi ne, %13, %c0_i32_8 : i32
    scf.if %14 {
      %15 = tpu.iota {dimensions = array<i32: 1>} : vector<1x128xi32>
      %c32_i32 = arith.constant 32 : i32
      %16 = vector.broadcast %c32_i32 : i32 to vector<1x128xi32>
      %17 = arith.cmpi slt, %15, %16 : vector<1x128xi32>
      %18 = arith.extui %17 : vector<1x128xi1> to vector<1x128xi32>
      %19 = arith.sitofp %18 : vector<1x128xi32> to vector<1x128xf32>
      %c0_9 = arith.constant 0 : index
      %c0_10 = arith.constant 0 : index
      %20 = vector.load %arg13[%c0_9, %c0_10] : memref<128x128xf32, #tpu.memory_space<vmem>>, vector<128x128xf32>
      %c0_11 = arith.constant 0 : index
      %c0_12 = arith.constant 0 : index
      %21 = vector.load %arg4[%c0_11, %c0_12] : memref<1x128xf32, #tpu.memory_space<vmem>>, vector<1x128xf32>
      %22 = vector.broadcast %21 : vector<1x128xf32> to vector<128x128xf32>
      %23 = arith.addf %20, %22 : vector<128x128xf32>
      %cst_13 = arith.constant 0.000000e+00 : f32
      %24 = vector.broadcast %cst_13 : f32 to vector<128x128xf32>
      %25 = arith.maximumf %23, %24 : vector<128x128xf32>
      %26 = vector.broadcast %19 : vector<1x128xf32> to vector<128x128xf32>
      %27 = arith.mulf %25, %26 : vector<128x128xf32>
      %cst_14 = arith.constant dense<0.000000e+00> : vector<128xf32>
      %28 = vector.multi_reduction <add>, %27, %cst_14 [1] : vector<128x128xf32> to vector<128xf32>
      %29 = vector.shape_cast %28 : vector<128xf32> to vector<128x1xf32>
      %cst_15 = arith.constant 3.125000e-02 : f32
      %30 = vector.broadcast %cst_15 : f32 to vector<128x1xf32>
      %31 = arith.mulf %29, %30 : vector<128x1xf32>
      %32 = vector.broadcast %31 : vector<128x1xf32> to vector<128x128xf32>
      %33 = arith.subf %27, %32 : vector<128x128xf32>
      %34 = vector.broadcast %19 : vector<1x128xf32> to vector<128x128xf32>
      %35 = arith.mulf %33, %34 : vector<128x128xf32>
      %36 = arith.mulf %35, %35 : vector<128x128xf32>
      %cst_16 = arith.constant dense<0.000000e+00> : vector<128xf32>
      %37 = vector.multi_reduction <add>, %36, %cst_16 [1] : vector<128x128xf32> to vector<128xf32>
      %38 = vector.shape_cast %37 : vector<128xf32> to vector<128x1xf32>
      %cst_17 = arith.constant 3.125000e-02 : f32
      %39 = vector.broadcast %cst_17 : f32 to vector<128x1xf32>
      %40 = arith.mulf %38, %39 : vector<128x1xf32>
      %cst_18 = arith.constant 9.99999974E-6 : f32
      %41 = vector.broadcast %cst_18 : f32 to vector<128x1xf32>
      %42 = arith.addf %40, %41 : vector<128x1xf32>
      %43 = math.rsqrt %42 : vector<128x1xf32>
      %44 = vector.broadcast %43 : vector<128x1xf32> to vector<128x128xf32>
      %45 = arith.mulf %35, %44 : vector<128x128xf32>
      %c0_19 = arith.constant 0 : index
      %c0_20 = arith.constant 0 : index
      %46 = vector.load %arg5[%c0_19, %c0_20] : memref<1x128xf32, #tpu.memory_space<vmem>>, vector<1x128xf32>
      %47 = vector.broadcast %46 : vector<1x128xf32> to vector<128x128xf32>
      %48 = arith.mulf %45, %47 : vector<128x128xf32>
      %c0_21 = arith.constant 0 : index
      %c0_22 = arith.constant 0 : index
      %49 = vector.load %arg6[%c0_21, %c0_22] : memref<1x128xf32, #tpu.memory_space<vmem>>, vector<1x128xf32>
      %50 = vector.broadcast %49 : vector<1x128xf32> to vector<128x128xf32>
      %51 = arith.addf %48, %50 : vector<128x128xf32>
      %c0_23 = arith.constant 0 : index
      %c0_24 = arith.constant 0 : index
      %52 = vector.load %arg11[%c0_23, %c0_24] : memref<128x128xf32, #tpu.memory_space<vmem>>, vector<128x128xf32>
      tpu.vector_store %arg11[%c0_23, %c0_24], %51 {strides = array<i32>} : memref<128x128xf32, #tpu.memory_space<vmem>>, vector<128x128xf32>,
      %53 = arith.truncf %51 : vector<128x128xf32> to vector<128x128xbf16>
      %c0_25 = arith.constant 0 : index
      %c0_26 = arith.constant 0 : index
      %54 = vector.load %arg7[%c0_25, %c0_26] : memref<128x128xbf16, #tpu.memory_space<vmem>>, vector<128x128xbf16>
      %cst_27 = arith.constant dense<0.000000e+00> : vector<128x128xf32>
      %55 = tpu.matmul %53, %54, %cst_27 {dimension_numbers = #tpu.dot_dimension_numbers<[1], [0], [0], [1], [0, 0, 1, 1], [], []>} : vector<128x128xbf16>, vector<128x128xbf16>, vector<128x128xf32> -> vector<128x128xf32>
      %c0_28 = arith.constant 0 : index
      %c0_29 = arith.constant 0 : index
      %56 = vector.load %arg8[%c0_28, %c0_29] : memref<1x128xf32, #tpu.memory_space<vmem>>, vector<1x128xf32>
      %57 = vector.broadcast %56 : vector<1x128xf32> to vector<128x128xf32>
      %58 = arith.addf %55, %57 : vector<128x128xf32>
      %59 = arith.truncf %58 : vector<128x128xf32> to vector<128x128xbf16>
      %c0_30 = arith.constant 0 : index
      %c0_31 = arith.constant 0 : index
      %60 = vector.load %arg9[%c0_30, %c0_31] : memref<128x128xbf16, #tpu.memory_space<vmem>>, vector<128x128xbf16>
      %cst_32 = arith.constant dense<0.000000e+00> : vector<128x128xf32>
      %61 = tpu.matmul %59, %60, %cst_32 {dimension_numbers = #tpu.dot_dimension_numbers<[1], [0], [0], [1], [0, 0, 1, 1], [], []>} : vector<128x128xbf16>, vector<128x128xbf16>, vector<128x128xf32> -> vector<128x128xf32>
      %c0_33 = arith.constant 0 : index
      %c0_34 = arith.constant 0 : index
      %62 = vector.load %arg10[%c0_33, %c0_34] : memref<1x128xf32, #tpu.memory_space<vmem>>, vector<1x128xf32>
      %63 = vector.broadcast %62 : vector<1x128xf32> to vector<128x128xf32>
      %64 = arith.addf %61, %63 : vector<128x128xf32>
      %65 = tpu.iota {dimensions = array<i32: 1>} : vector<1x128xi32>
      %c4_i32 = arith.constant 4 : i32
      %66 = vector.broadcast %c4_i32 : i32 to vector<1x128xi32>
      %67 = arith.cmpi slt, %65, %66 : vector<1x128xi32>
      %cst_35 = arith.constant -1.000000e+30 : f32
      %68 = vector.shape_cast %67 : vector<1x128xi1> to vector<1x128xi1>
      %69 = vector.broadcast %68 : vector<1x128xi1> to vector<128x128xi1>
      %70 = vector.broadcast %cst_35 : f32 to vector<128x128xf32>
      %71 = arith.select %69, %64, %70 : vector<128x128xi1>, vector<128x128xf32>
      %cst_36 = arith.constant dense<0xFF800000> : vector<128xf32>
      %72 = vector.multi_reduction <maximumf>, %71, %cst_36 [1] : vector<128x128xf32> to vector<128xf32>
      %73 = vector.shape_cast %72 : vector<128xf32> to vector<128x1xf32>
      %74 = vector.broadcast %73 : vector<128x1xf32> to vector<128x128xf32>
      %75 = arith.subf %71, %74 : vector<128x128xf32>
      %76 = math.exp %75 : vector<128x128xf32>
      %cst_37 = arith.constant dense<0.000000e+00> : vector<128xf32>
      %77 = vector.multi_reduction <add>, %76, %cst_37 [1] : vector<128x128xf32> to vector<128xf32>
      %78 = vector.shape_cast %77 : vector<128xf32> to vector<128x1xf32>
      %79 = math.log %78 : vector<128x1xf32>
      %80 = vector.broadcast %79 : vector<128x1xf32> to vector<128x128xf32>
      %81 = arith.subf %75, %80 : vector<128x128xf32>
      %c0_38 = arith.constant 0 : index
      %c0_39 = arith.constant 0 : index
      %82 = vector.load %arg12[%c0_38, %c0_39] : memref<128x128xf32, #tpu.memory_space<vmem>>, vector<128x128xf32>
      tpu.vector_store %arg12[%c0_38, %c0_39], %81 {strides = array<i32>} : memref<128x128xf32, #tpu.memory_space<vmem>>, vector<128x128xf32>,
    } else {
    }
    return
  }
  func.func @transform_0(%arg0: i32, %arg1: i32) -> (i32, i32) {
    %c0_i32 = arith.constant 0 : i32
    return %arg0, %arg1 : i32, i32
  }
  func.func @transform_1(%arg0: i32, %arg1: i32) -> (i32, i32) {
    %c0_i32 = arith.constant 0 : i32
    %c0_i32_0 = arith.constant 0 : i32
    %c0_i32_1 = arith.constant 0 : i32
    return %c0_i32, %c0_i32_0 : i32, i32
  }
  func.func @transform_2(%arg0: i32, %arg1: i32) -> (i32, i32) {
    %c0_i32 = arith.constant 0 : i32
    %c0_i32_0 = arith.constant 0 : i32
    %c0_i32_1 = arith.constant 0 : i32
    return %c0_i32, %c0_i32_0 : i32, i32
  }
  func.func @transform_3(%arg0: i32, %arg1: i32) -> (i32, i32) {
    %c0_i32 = arith.constant 0 : i32
    %c0_i32_0 = arith.constant 0 : i32
    %c0_i32_1 = arith.constant 0 : i32
    return %c0_i32, %c0_i32_0 : i32, i32
  }
  func.func @transform_4(%arg0: i32, %arg1: i32) -> (i32, i32) {
    %c0_i32 = arith.constant 0 : i32
    %c0_i32_0 = arith.constant 0 : i32
    %c0_i32_1 = arith.constant 0 : i32
    return %c0_i32, %c0_i32_0 : i32, i32
  }
  func.func @transform_5(%arg0: i32, %arg1: i32) -> (i32, i32) {
    %c0_i32 = arith.constant 0 : i32
    %c0_i32_0 = arith.constant 0 : i32
    %c0_i32_1 = arith.constant 0 : i32
    return %c0_i32, %c0_i32_0 : i32, i32
  }
  func.func @transform_6(%arg0: i32, %arg1: i32) -> (i32, i32) {
    %c0_i32 = arith.constant 0 : i32
    %c0_i32_0 = arith.constant 0 : i32
    %c0_i32_1 = arith.constant 0 : i32
    return %c0_i32, %c0_i32_0 : i32, i32
  }
  func.func @transform_7(%arg0: i32, %arg1: i32) -> (i32, i32) {
    %c0_i32 = arith.constant 0 : i32
    %c0_i32_0 = arith.constant 0 : i32
    %c0_i32_1 = arith.constant 0 : i32
    return %c0_i32, %c0_i32_0 : i32, i32
  }
  func.func @transform_8(%arg0: i32, %arg1: i32) -> (i32, i32) {
    %c0_i32 = arith.constant 0 : i32
    %c0_i32_0 = arith.constant 0 : i32
    %c0_i32_1 = arith.constant 0 : i32
    return %c0_i32, %c0_i32_0 : i32, i32
  }
  func.func @transform_9(%arg0: i32, %arg1: i32) -> (i32, i32) {
    %c0_i32 = arith.constant 0 : i32
    %c0_i32_0 = arith.constant 0 : i32
    return %arg0, %c0_i32 : i32, i32
  }
  func.func @transform_10(%arg0: i32, %arg1: i32) -> (i32, i32) {
    %c0_i32 = arith.constant 0 : i32
    %c0_i32_0 = arith.constant 0 : i32
    return %arg0, %c0_i32 : i32, i32
  }
}

</mosaic_0001>

<bundles_post_ra>
// kernel: tpu_custom_call.1
= control target key start
LH: loop header
LB: loop body
LE: loop exit
PB: predicated region body
PF: predicated region fallthrough
CT: control target
= control target key end

     0   :  { %16 = vsyncpa [#allocation4], 0  ;;  %s2297_s0 = inlined_call_operand.hbm [shape: bf16[128,128], index: 0, kind: input, shape index: {}]   ;;  %s2298_s1 = inlined_call_operand.hbm [shape: bf16[128,128], index: 1, kind: input, shape index: {}]   ;;  %s2299_s2 = inlined_call_operand.vmem [shape: f32[1,128], index: 2, kind: input, shape index: {}]   ;;  %s2300_s3 = inlined_call_operand.vmem [shape: f32[1,128], index: 3, kind: input, shape index: {}]   ;;  %s2301_s4 = inlined_call_operand.vmem [shape: f32[1,128], index: 4, kind: input, shape index: {}]   ;;  %s2302_s5 = inlined_call_operand.hbm [shape: bf16[128,128], index: 5, kind: input, shape index: {}]   ;;  %s2303_s6 = inlined_call_operand.vmem [shape: f32[1,128], index: 6, kind: input, shape index: {}]   ;;  %s2304_s7 = inlined_call_operand.hbm [shape: bf16[128,128], index: 7, kind: input, shape index: {}]   ;;  %s2305_s8 = inlined_call_operand.vmem [shape: f32[1,128], index: 8, kind: input, shape index: {}]   ;;  %s2306_s9 = inlined_call_operand.hbm [shape: f32[128,128], index: 9, kind: output, shape index: {0}]   ;;  %s2307_s10 = inlined_call_operand.hbm [shape: f32[128,128], index: 10, kind: output, shape index: {1}]  }
   0x1   :  { %17 = vsyncpa [#allocation7], 0 }
   0x2   :  { %18 = vsyncpa [#allocation10], 0 }
   0x3   :  { %19 = vsyncpa [#allocation5], 0 }
   0x4   :  { %20 = vsyncpa [#allocation13], 0  ;;  %s38_s15 = sshll.u32 %s2298_s1, 4  ;;  %s1754_s16 = smov [#allocation6]   ;;  %s39_s15 = int_to_ptr.hbm [resolvable:$true] %s38_s15 }
   0x5   :  { %s40_s17 = sshll.u32 %s1754_s16, 4  ;;  %s25_s20 = sshll.u32 %s2297_s0, 4  ;;  %s41_s17 = int_to_ptr.vmem [resolvable:$true] %s40_s17  ;;  %s26_s20 = int_to_ptr.hbm [resolvable:$true] %s25_s20 }
   0x6   :  { %s1755_s21 = smov 64   ;;  %s1756_s22 = smov 4  }
   0x7   :  { %46 = dma.hbm_to_vmem [thread:$0]  %s39_s15, 1024, %s41_s17, [#allocation7], %s1755_s21, %s1755_s21, %s1756_s22  }
   0x8   :  { %s1757_s23 = smov [#allocation3]   ;;  %s57_s27 = sshll.u32 %s2302_s5, 4  ;;  %s58_s27 = int_to_ptr.hbm [resolvable:$true] %s57_s27 }
   0x9   :  { %s27_s24 = sshll.u32 %s1757_s23, 4  ;;  %s72_s29 = sshll.u32 %s2304_s7, 4  ;;  %s28_s24 = int_to_ptr.vmem [resolvable:$true] %s27_s24  ;;  %s73_s29 = int_to_ptr.hbm [resolvable:$true] %s72_s29 }
   0xa   :  { %33 = dma.hbm_to_vmem [thread:$0]  %s26_s20, 1024, %s28_s24, [#allocation4], %s1755_s21, %s1755_s21, %s1756_s22  }
   0xb   :  { %s1758_s30 = smov [#allocation8]   ;;  %s1759_s0 = smov [#allocation9]  }
   0xc   :  { %s59_s11 = sshll.u32 %s1758_s30, 4  ;;  %s74_s12 = sshll.u32 %s1759_s0, 4  ;;  %s60_s11 = int_to_ptr.vmem [resolvable:$true] %s59_s11  ;;  %s75_s12 = int_to_ptr.vmem [resolvable:$true] %s74_s12 }
   0xd   :  { %65 = dma.hbm_to_vmem [thread:$0]  %s58_s27, 1024, %s60_s11, [#allocation7], %s1755_s21, %s1755_s21, %s1756_s22  }
   0xe   :  { %80 = dma.hbm_to_vmem [thread:$0]  %s73_s29, 1024, %s75_s12, [#allocation10], %s1755_s21, %s1755_s21, %s1756_s22  }
   0xf   :  { %1744 = dma.done.wait [#allocation4], 1024  }
  0x10   :  { %1745 = vsyncadd [#allocation4], 4294966272 }
  0x11   :  { %1746 = dma.done.wait [#allocation7], 2048  }
  0x12   :  { %1747 = vsyncadd [#allocation7], 4294965248 }
  0x13   :  { %1748 = dma.done.wait [#allocation10], 1024  }
  0x14   :  { %1749 = vsyncadd [#allocation10], 4294966272  ;;  %v1439_v0 = vld [vmem:[#allocation6 + $0x38] sm:$0xff]  ;;  %v1438_v1 = vld [vmem:[#allocation6 + $0x30] sm:$0xff]  ;;  %v352_v16 = vlaneseq  ;;  %v1760_v21 = vmov 0.0   ;;  %s1268_s20 = sshll.u32 %s2306_s9, 4  ;;  %s1269_s20 = int_to_ptr.hbm [resolvable:$true] %s1268_s20 }
  0x15   :  { %268 = vmatpush.bf16.msra.mxu0 %v1439_v0  ;;  %1464 = vmatpush.bf16.msra.mxu3 %v1439_v0  ;;  %v1437_v2 = vld [vmem:[#allocation6 + $0x28] sm:$0xff]  ;;  %v1436_v3 = vld [vmem:[#allocation6 + $0x20] sm:$0xff]  ;;  %v1435_v4 = vld [vmem:[#allocation6 + $0x18] sm:$0xff]  ;;  %s1762_s21 = smov 128   ;;  %s1763_s22 = smov 8  }
  0x16   :  { %v1434_v5 = vld [vmem:[#allocation6 + $0x10] sm:$0xff]  ;;  %v1433_v6 = vld [vmem:[#allocation6 + $0x8] sm:$0xff]  ;;  %v1432_v7 = vld [vmem:[#allocation6] sm:$0xff]  ;;  %v1832_v17 = vand.u32 127, %v352_v16  ;;  %s1764_s9 = smov [#allocation12]   ;;  %s1281_s26 = sshll.u32 %s2307_s10, 4  ;;  %s1282_s26 = int_to_ptr.hbm [resolvable:$true] %s1281_s26 }
  0x17   :  { %v1440_v8 = vld [vmem:[#allocation3] sm:$0xff]  ;;  %v1441_v9 = vld [vmem:[#allocation3 + $0x8] sm:$0xff]  ;;  %v1446_v10 = vld [vmem:[#allocation3 + $0x30] sm:$0xff]  ;;  %s1279_s23 = sshll.u32 %s1764_s9, 4  ;;  %s1280_s23 = int_to_ptr.vmem [resolvable:$true] %s1279_s23 }
  0x18   :  { %v1442_v11 = vld [vmem:[#allocation3 + $0x10] sm:$0xff]  ;;  %v1447_v12 = vld [vmem:[#allocation3 + $0x38] sm:$0xff]  ;;  %v1444_v14 = vld [vmem:[#allocation3 + $0x20] sm:$0xff]  ;;  %vm354_vm0 = vcmp.lt.s32.totalorder %v1832_v17, 32 }
  0x19   :  { %269 = vmatpush.bf16.msra.mxu0 %v1438_v1  ;;  %1465 = vmatpush.bf16.msra.mxu3 %v1438_v1  ;;  %v1443_v13 = vld [vmem:[#allocation3 + $0x18] sm:$0xff]  ;;  %v1445_v15 = vld [vmem:[#allocation3 + $0x28] sm:$0xff]  ;;  %v1837_v18 = vld [vmem:[%s2299_s2] ss:$0 sm:$0xff]  ;;  %v1841_v22 = vsel %vm354_vm0, 1.0, %v1760_v21 }
  0x1d   :  { %270 = vmatpush.bf16.msra.mxu0 %v1437_v2  ;;  %1466 = vmatpush.bf16.msra.mxu3 %v1437_v2 }
  0x21   :  { %271 = vmatpush.bf16.msra.mxu0 %v1436_v3  ;;  %1467 = vmatpush.bf16.msra.mxu3 %v1436_v3 }
  0x25   :  { %272 = vmatpush.bf16.msra.mxu0 %v1435_v4  ;;  %1468 = vmatpush.bf16.msra.mxu3 %v1435_v4 }
  0x29   :  { %273 = vmatpush.bf16.msra.mxu0 %v1434_v5  ;;  %1469 = vmatpush.bf16.msra.mxu3 %v1434_v5 }
  0x2d   :  { %274 = vmatpush.bf16.msra.mxu0 %v1433_v6  ;;  %1470 = vmatpush.bf16.msra.mxu3 %v1433_v6 }
  0x31   :  { %275 = vmatpush.bf16.msra.mxu0 %v1432_v7  ;;  %1471 = vmatpush.bf16.msra.mxu3 %v1432_v7 }
  0x34   :  { %276 = vmatmul.bf16.vlgmr.msra.gmra.mxu0 %v1440_v8  ;;  %306 = vmatmul.bf16.vlgmr.msra.gmra.mxu3 %v1446_v10 }
  0x44   :  { %281 = vmatmul.bf16.gmra.mxu0 %v1441_v9  ;;  %311 = vmatmul.bf16.gmra.mxu3 %v1447_v12 }
  0x54   :  { %286 = vmatmul.bf16.gmra.mxu0 %v1442_v11 }
  0x64   :  { %291 = vmatmul.bf16.gmra.mxu0 %v1443_v13 }
  0x74   :  { %296 = vmatmul.bf16.gmra.mxu0 %v1444_v14 }
  0x84   :  { %301 = vmatmul.bf16.gmra.mxu0 %v1445_v15 }
  0xb1   :  { %v277_v19 = vpop.f32.mrf.mxu0 }
  0xb2   :  { %v377_v20 = vadd.f32 %v1837_v18, %v277_v19 }
  0xb4   :  { %v393_v23 = vmax.f32 %v377_v20, 0.0 }
  0xb6   :  { %v1844_v24 = vmul.f32 %v1841_v22, %v393_v23 }
  0xb7   :  { %v307_v48 = vpop.f32.mrf.mxu3 }
  0xb8   :  { %425 = vadd.xlane.f32.xlu0 %v1844_v24  ;;  %v389_v53 = vadd.f32 %v1837_v18, %v307_v48 }
  0xb9   :  { %v279_v25 = vpop.f32.mrf.mxu0 }
  0xba   :  { %v378_v26 = vadd.f32 %v1837_v18, %v279_v25  ;;  %v405_v56 = vmax.f32 %v389_v53, 0.0 }
  0xbc   :  { %v394_v27 = vmax.f32 %v378_v26, 0.0  ;;  %v1884_v58 = vmul.f32 %v1841_v22, %v405_v56 }
  0xbe   :  { %v1849_v28 = vmul.f32 %v1841_v22, %v394_v27 }
  0xbf   :  { %v309_v55 = vpop.f32.mrf.mxu3 }
  0xc0   :  { %427 = vadd.xlane.f32.xlu0 %v1849_v28  ;;  %v390_v12 = vadd.f32 %v1837_v18, %v309_v55 }
  0xc1   :  { %v282_v29 = vpop.f32.mrf.mxu0 }
  0xc2   :  { %v379_v30 = vadd.f32 %v1837_v18, %v282_v29  ;;  %v406_v16 = vmax.f32 %v390_v12, 0.0 }
  0xc4   :  { %v395_v31 = vmax.f32 %v379_v30, 0.0  ;;  %v1915_v23 = vmul.f32 %v1841_v22, %v406_v16  ;;  %v1452_v16 = vld [vmem:[#allocation8 + $0x20] sm:$0xff] }
  0xc6   :  { %v1854_v32 = vmul.f32 %v1841_v22, %v395_v31 }
  0xc7   :  { %v312_v60 = vpop.f32.mrf.mxu3 }
  0xc8   :  { %429 = vadd.xlane.f32.xlu1 %v1854_v32  ;;  %v391_v63 = vadd.f32 %v1837_v18, %v312_v60 }
  0xc9   :  { %v284_v33 = vpop.f32.mrf.mxu0 }
  0xca   :  { %v380_v34 = vadd.f32 %v1837_v18, %v284_v33  ;;  %v407_v1 = vmax.f32 %v391_v63, 0.0 }
  0xcc   :  { %v396_v35 = vmax.f32 %v380_v34, 0.0  ;;  %v1894_v3 = vmul.f32 %v1841_v22, %v407_v1 }
  0xce   :  { %v1859_v36 = vmul.f32 %v1841_v22, %v396_v35 }
  0xcf   :  { %v314_v27 = vpop.f32.mrf.mxu3 }
  0xd0   :  { %431 = vadd.xlane.f32.xlu1 %v1859_v36  ;;  %v392_v31 = vadd.f32 %v1837_v18, %v314_v27 }
  0xd1   :  { %v287_v37 = vpop.f32.mrf.mxu0 }
  0xd2   :  { %v381_v38 = vadd.f32 %v1837_v18, %v287_v37 }
  0xd4   :  { %v397_v39 = vmax.f32 %v381_v38, 0.0  ;;  %v408_v38 = vmax.f32 %v392_v31, 0.0 }
  0xd6   :  { %v1864_v40 = vmul.f32 %v1841_v22, %v397_v39 }
  0xd8   :  { %433 = vadd.xlane.f32.xlu2 %v1864_v40 }
  0xd9   :  { %v289_v41 = vpop.f32.mrf.mxu0 }
  0xda   :  { %v382_v42 = vadd.f32 %v1837_v18, %v289_v41 }
  0xdc   :  { %v398_v43 = vmax.f32 %v382_v42, 0.0 }
  0xde   :  { %v1869_v44 = vmul.f32 %v1841_v22, %v398_v43 }
  0xe0   :  { %435 = vadd.xlane.f32.xlu2 %v1869_v44 }
  0xe1   :  { %v292_v45 = vpop.f32.mrf.mxu0 }
  0xe2   :  { %v383_v46 = vadd.f32 %v1837_v18, %v292_v45 }
  0xe4   :  { %v399_v47 = vmax.f32 %v383_v46, 0.0 }
  0xe6   :  { %v1874_v49 = vmul.f32 %v1841_v22, %v399_v47 }
  0xe8   :  { %437 = vadd.xlane.f32.xlu0 %v1874_v49 }
  0xe9   :  { %v294_v50 = vpop.f32.mrf.mxu0 }
  0xea   :  { %v384_v51 = vadd.f32 %v1837_v18, %v294_v50 }
  0xec   :  { %v400_v52 = vmax.f32 %v384_v51, 0.0 }
  0xee   :  { %v1880_v54 = vmul.f32 %v1841_v22, %v400_v52 }
  0xf0   :  { %439 = vadd.xlane.f32.xlu1 %v1880_v54 }
  0xf1   :  { %v297_v57 = vpop.f32.mrf.mxu0 }
  0xf2   :  { %v385_v21 = vadd.f32 %v1837_v18, %v297_v57 }
  0xf4   :  { %v401_v29 = vmax.f32 %v385_v21, 0.0  ;;  %v1449_v21 = vld [vmem:[#allocation8 + $0x8] sm:$0xff] }
  0xf6   :  { %v1928_v34 = vmul.f32 %v1841_v22, %v401_v29 }
  0xf8   :  { %449 = vadd.xlane.f32.xlu1 %v1884_v58 }
  0xf9   :  { %v299_v59 = vpop.f32.mrf.mxu0 }
  0xfa   :  { %v386_v61 = vadd.f32 %v1837_v18, %v299_v59 }
  0xfc   :  { %v402_v62 = vmax.f32 %v386_v61, 0.0 }
  0xfe   :  { %v1890_v0 = vmul.f32 %v1841_v22, %v402_v62 }
 0x100   :  { %443 = vadd.xlane.f32.xlu1 %v1890_v0 }
 0x101   :  { %v302_v2 = vpop.f32.mrf.mxu0 }
 0x102   :  { %v387_v42 = vadd.f32 %v1837_v18, %v302_v2 }
 0x104   :  { %v403_v47 = vmax.f32 %v387_v42, 0.0 }
 0x106   :  { %v1949_v51 = vmul.f32 %v1841_v22, %v403_v47 }
 0x108   :  { %453 = vadd.xlane.f32.xlu1 %v1894_v3 }
 0x109   :  { %v304_v4 = vpop.f32.mrf.mxu0 }
 0x10a   :  { %v388_v5 = vadd.f32 %v1837_v18, %v304_v4 }
 0x10c   :  { %v404_v6 = vmax.f32 %v388_v5, 0.0 }
 0x10e   :  { %v1899_v7 = vmul.f32 %v1841_v22, %v404_v6 }
 0x110   :  { %447 = vadd.xlane.f32.xlu1 %v1899_v7 }
 0x12b   :  { %v426_v8 = vpop.xlane.xlu0 %425 }
 0x12c   :  { %v457_v9 = vmul.f32 0.03125, %v426_v8 }
 0x12e   :  { %v473_v10 = vsub.f32 %v1844_v24, %v457_v9 }
 0x130   :  { %v1904_v11 = vmul.f32 %v1841_v22, %v473_v10 }
 0x132   :  { %v505_v13 = vmul.f32 %v1904_v11, %v1904_v11 }
 0x133   :  { %v428_v14 = vpop.xlane.xlu0 %427 }
 0x134   :  { %v458_v15 = vmul.f32 0.03125, %v428_v14  ;;  %521 = vadd.xlane.f32.xlu2 %v505_v13  ;;  %v1455_v14 = vld [vmem:[#allocation8 + $0x38] sm:$0xff] }
 0x135   :  { %893 = vmatpush.bf16.msra.mxu1 %v1455_v14  ;;  %1472 = vmatpush.bf16.msrb.mxu3 %v1455_v14 }
 0x136   :  { %v474_v19 = vsub.f32 %v1849_v28, %v458_v15  ;;  %v1453_v15 = vld [vmem:[#allocation8 + $0x28] sm:$0xff] }
 0x138   :  { %v1911_v20 = vmul.f32 %v1841_v22, %v474_v19  ;;  %v1450_v19 = vld [vmem:[#allocation8 + $0x10] sm:$0xff] }
 0x13a   :  { %v506_v24 = vmul.f32 %v1911_v20, %v1911_v20 }
 0x13b   :  { %v430_v25 = vpop.xlane.xlu1 %429 }
 0x13c   :  { %v459_v26 = vmul.f32 0.03125, %v430_v25  ;;  %451 = vadd.xlane.f32.xlu2 %v1915_v23  ;;  %523 = vadd.xlane.f32.xlu0 %v506_v24 }
 0x13e   :  { %v475_v28 = vsub.f32 %v1854_v32, %v459_v26  ;;  %v1933_v32 = vmul.f32 %v1841_v22, %v408_v38  ;;  %v1448_v26 = vld [vmem:[#allocation8] sm:$0xff] }
 0x140   :  { %v1922_v30 = vmul.f32 %v1841_v22, %v475_v28 }
 0x142   :  { %v507_v33 = vmul.f32 %v1922_v30, %v1922_v30 }
 0x143   :  { %v432_v35 = vpop.xlane.xlu1 %431 }
 0x144   :  { %v460_v37 = vmul.f32 0.03125, %v432_v35  ;;  %525 = vadd.xlane.f32.xlu2 %v507_v33  ;;  %441 = vadd.xlane.f32.xlu0 %v1928_v34 }
 0x146   :  { %v476_v39 = vsub.f32 %v1859_v36, %v460_v37 }
 0x148   :  { %v1936_v41 = vmul.f32 %v1841_v22, %v476_v39 }
 0x14a   :  { %v508_v43 = vmul.f32 %v1936_v41, %v1936_v41 }
 0x14b   :  { %v434_v45 = vpop.xlane.xlu2 %433 }
 0x14c   :  { %v461_v46 = vmul.f32 0.03125, %v434_v45  ;;  %455 = vadd.xlane.f32.xlu2 %v1933_v32  ;;  %527 = vadd.xlane.f32.xlu0 %v508_v43 }
 0x14e   :  { %v477_v48 = vsub.f32 %v1864_v40, %v461_v46 }
 0x150   :  { %v1944_v36 = vmul.f32 %v1841_v22, %v477_v48 }
 0x152   :  { %v509_v50 = vmul.f32 %v1944_v36, %v1944_v36 }
 0x153   :  { %v436_v18 = vpop.xlane.xlu2 %435 }
 0x154   :  { %v462_v52 = vmul.f32 0.03125, %v436_v18  ;;  %529 = vadd.xlane.f32.xlu2 %v509_v50  ;;  %445 = vadd.xlane.f32.xlu0 %v1949_v51 }
 0x156   :  { %v478_v53 = vsub.f32 %v1869_v44, %v462_v52 }
 0x158   :  { %v1954_v55 = vmul.f32 %v1841_v22, %v478_v53 }
 0x15a   :  { %v510_v40 = vmul.f32 %v1954_v55, %v1954_v55 }
 0x15b   :  { %v438_v56 = vpop.xlane.xlu0 %437 }
 0x15c   :  { %v463_v57 = vmul.f32 0.03125, %v438_v56  ;;  %531 = vadd.xlane.f32.xlu0 %v510_v40 }
 0x15e   :  { %v479_v59 = vsub.f32 %v1874_v49, %v463_v57 }
 0x160   :  { %v1960_v60 = vmul.f32 %v1841_v22, %v479_v59 }
 0x162   :  { %v511_v61 = vmul.f32 %v1960_v60, %v1960_v60 }
 0x163   :  { %v440_v62 = vpop.xlane.xlu1 %439 }
 0x164   :  { %v464_v63 = vmul.f32 0.03125, %v440_v62  ;;  %533 = vadd.xlane.f32.xlu1 %v511_v61 }
 0x166   :  { %v480_v44 = vsub.f32 %v1880_v54, %v464_v63 }
 0x168   :  { %v1966_v1 = vmul.f32 %v1841_v22, %v480_v44 }
 0x16a   :  { %v512_v2 = vmul.f32 %v1966_v1, %v1966_v1 }
 0x16b   :  { %v450_v4 = vpop.xlane.xlu1 %449 }
 0x16c   :  { %v469_v5 = vmul.f32 0.03125, %v450_v4  ;;  %535 = vadd.xlane.f32.xlu2 %v512_v2  ;;  %v1999_v4 = vld [vmem:[%s2300_s3] ss:$0 sm:$0xff] }
 0x16e   :  { %v485_v49 = vsub.f32 %v1884_v58, %v469_v5  ;;  %v1454_v58 = vld [vmem:[#allocation8 + $0x30] sm:$0xff] }
 0x16f   :  { %894 = vmatpush.bf16.msra.mxu1 %v1454_v58  ;;  %1473 = vmatpush.bf16.msrb.mxu3 %v1454_v58 }
 0x170   :  { %v1972_v6 = vmul.f32 %v1841_v22, %v485_v49 }
 0x172   :  { %v517_v8 = vmul.f32 %v1972_v6, %v1972_v6 }
 0x173   :  { %v444_v9 = vpop.xlane.xlu1 %443  ;;  %895 = vmatpush.bf16.msra.mxu1 %v1453_v15  ;;  %1474 = vmatpush.bf16.msrb.mxu3 %v1453_v15 }
 0x174   :  { %v466_v10 = vmul.f32 0.03125, %v444_v9  ;;  %545 = vadd.xlane.f32.xlu0 %v517_v8 }
 0x176   :  { %v482_v54 = vsub.f32 %v1890_v0, %v466_v10  ;;  %v1451_v0 = vld [vmem:[#allocation8 + $0x18] sm:$0xff] }
 0x177   :  { %896 = vmatpush.bf16.msra.mxu1 %v1452_v16  ;;  %1475 = vmatpush.bf16.msrb.mxu3 %v1452_v16 }
 0x178   :  { %v1978_v12 = vmul.f32 %v1841_v22, %v482_v54  ;;  %v2010_v54 = vld [vmem:[%s2301_s4] ss:$0 sm:$0xff] }
 0x17a   :  { %v514_v13 = vmul.f32 %v1978_v12, %v1978_v12 }
 0x17b   :  { %897 = vmatpush.bf16.msra.mxu1 %v1451_v0  ;;  %1476 = vmatpush.bf16.msrb.mxu3 %v1451_v0  ;;  %v454_v29 = vpop.xlane.xlu1 %453 }
 0x17c   :  { %539 = vadd.xlane.f32.xlu0 %v514_v13  ;;  %v471_v38 = vmul.f32 0.03125, %v454_v29 }
 0x17e   :  { %v487_v47 = vsub.f32 %v1894_v3, %v471_v38 }
 0x17f   :  { %898 = vmatpush.bf16.msra.mxu1 %v1450_v19  ;;  %1477 = vmatpush.bf16.msrb.mxu3 %v1450_v19 }
 0x180   :  { %v1991_v63 = vmul.f32 %v1841_v22, %v487_v47 }
 0x182   :  { %v519_v9 = vmul.f32 %v1991_v63, %v1991_v63 }
 0x183   :  { %899 = vmatpush.bf16.msra.mxu1 %v1449_v21  ;;  %1478 = vmatpush.bf16.msrb.mxu3 %v1449_v21  ;;  %v448_v48 = vpop.xlane.xlu1 %447 }
 0x184   :  { %v468_v59 = vmul.f32 0.03125, %v448_v48 }
 0x187   :  { %900 = vmatpush.bf16.msra.mxu1 %v1448_v26  ;;  %1479 = vmatpush.bf16.msrb.mxu3 %v1448_v26 }
 0x1a7   :  { %v522_v24 = vpop.xlane.xlu2 %521 }
 0x1a8   :  { %v553_v25 = vmul.f32 0.03125, %v522_v24 }
 0x1aa   :  { %v569_v27 = vadd.f32 1e-05, %v553_v25 }
 0x1ac   :  { %1504 = vrsqrt.f32 %v569_v27  ;;  %vm591_vm2 = vweird.f32 %v569_v27 }
 0x1af   :  { %v452_v28 = vpop.xlane.xlu2 %451  ;;  %v524_v31 = vpop.xlane.xlu0 %523 }
 0x1b0   :  { %v470_v33 = vmul.f32 0.03125, %v452_v28  ;;  %v554_v35 = vmul.f32 0.03125, %v524_v31 }
 0x1b2   :  { %v1505_v37 = vpop.eup %1504  ;;  %v486_v39 = vsub.f32 %v1915_v23, %v470_v33  ;;  %v570_v42 = vadd.f32 1e-05, %v554_v35 }
 0x1b3   :  { %v586_v43 = vmul.f32 %v1505_v37, %v569_v27  ;;  %vm592_vm1 = vweird.f32 %v1505_v37 }
 0x1b4   :  { %1506 = vrsqrt.f32 %v570_v42  ;;  %v1984_v45 = vmul.f32 %v1841_v22, %v486_v39  ;;  %vm593_vm3 = vmor %vm591_vm2, %vm592_vm1  ;;  %vm601_vm5 = vweird.f32 %v570_v42 }
 0x1b5   :  { %v587_v46 = vmul.f32 %v1505_v37, %v586_v43 }
 0x1b6   :  { %v518_v50 = vmul.f32 %v1984_v45, %v1984_v45 }
 0x1b7   :  { %v588_v18 = vmul.f32 0.5, %v587_v46  ;;  %v526_v52 = vpop.xlane.xlu2 %525  ;;  %v442_v53 = vpop.xlane.xlu0 %441 }
 0x1b8   :  { %v555_v40 = vmul.f32 0.03125, %v526_v52  ;;  %v465_v56 = vmul.f32 0.03125, %v442_v53  ;;  %547 = vadd.xlane.f32.xlu1 %v518_v50 }
 0x1b9   :  { %v589_v23 = vsub.f32 1.5, %v588_v18 }
 0x1ba   :  { %v1507_v57 = vpop.eup %1506  ;;  %v571_v61 = vadd.f32 1e-05, %v555_v40  ;;  %v481_v62 = vsub.f32 %v1928_v34, %v465_v56  ;;  %v484_v34 = vsub.f32 %v1899_v7, %v468_v59 }
 0x1bb   :  { %v590_v3 = vmul.f32 %v1505_v37, %v589_v23  ;;  %v596_v44 = vmul.f32 %v1507_v57, %v570_v42  ;;  %vm602_vm4 = vweird.f32 %v1507_v57 }
 0x1bc   :  { %1508 = vrsqrt.f32 %v571_v61  ;;  %v1994_v2 = vmul.f32 %v1841_v22, %v481_v62  ;;  %v2015_v24 = vmul.f32 %v1841_v22, %v484_v34  ;;  %vm603_vm6 = vmor %vm601_vm5, %vm602_vm4  ;;  %vm611_vm8 = vweird.f32 %v571_v61 }
 0x1bd   :  { %v597_v5 = vmul.f32 %v1507_v57, %v596_v44  ;;  %v594_v49 = vsel %vm593_vm3, %v1505_v37, %v590_v3 }
 0x1be   :  { %v513_v8 = vmul.f32 %v1994_v2, %v1994_v2  ;;  %v745_v10 = vmul.f32 %v594_v49, %v1904_v11  ;;  %v516_v33 = vmul.f32 %v2015_v24, %v2015_v24 }
 0x1bf   :  { %v598_v13 = vmul.f32 0.5, %v597_v5  ;;  %v456_v14 = vpop.xlane.xlu2 %455  ;;  %v528_v58 = vpop.xlane.xlu0 %527 }
 0x1c0   :  { %v472_v15 = vmul.f32 0.03125, %v456_v14  ;;  %v556_v16 = vmul.f32 0.03125, %v528_v58  ;;  %537 = vadd.xlane.f32.xlu2 %v513_v8  ;;  %549 = vadd.xlane.f32.xlu1 %v519_v9  ;;  %v765_v7 = vmul.f32 %v1999_v4, %v745_v10 }
 0x1c1   :  { %v599_v0 = vsub.f32 1.5, %v598_v13 }
 0x1c2   :  { %v1509_v19 = vpop.eup %1508  ;;  %v488_v21 = vsub.f32 %v1933_v32, %v472_v15  ;;  %v572_v11 = vadd.f32 1e-05, %v556_v16  ;;  %v785_v25 = vadd.f32 %v2010_v54, %v765_v7 }
 0x1c3   :  { %v600_v26 = vmul.f32 %v1507_v57, %v599_v0  ;;  %v606_v27 = vmul.f32 %v1509_v19, %v571_v61  ;;  %vm612_vm7 = vweird.f32 %v1509_v19 }
 0x1c4   :  { %1510 = vrsqrt.f32 %v572_v11  ;;  %v2019_v29 = vmul.f32 %v1841_v22, %v488_v21  ;;  %801 = vst [vmem:[#allocation11] sm:$0xff] %v785_v25  ;;  %vm613_vm9 = vmor %vm611_vm8, %vm612_vm7  ;;  %vm621_vm11 = vweird.f32 %v572_v11 }
 0x1c5   :  { %v607_v28 = vmul.f32 %v1509_v19, %v606_v27  ;;  %v604_v31 = vsel %vm603_vm6, %v1507_v57, %v600_v26 }
 0x1c6   :  { %v520_v32 = vmul.f32 %v2019_v29, %v2019_v29  ;;  %v746_v35 = vmul.f32 %v604_v31, %v1911_v20 }
 0x1c7   :  { %v608_v37 = vmul.f32 0.5, %v607_v28  ;;  %v530_v38 = vpop.xlane.xlu2 %529  ;;  %v446_v39 = vpop.xlane.xlu0 %445 }
 0x1c8   :  { %v557_v42 = vmul.f32 0.03125, %v530_v38  ;;  %v467_v43 = vmul.f32 0.03125, %v446_v39  ;;  %551 = vadd.xlane.f32.xlu2 %v520_v32  ;;  %543 = vadd.xlane.f32.xlu1 %v516_v33  ;;  %v766_v46 = vmul.f32 %v1999_v4, %v746_v35 }
 0x1c9   :  { %v609_v47 = vsub.f32 1.5, %v608_v37 }
 0x1ca   :  { %v1511_v48 = vpop.eup %1510  ;;  %v573_v50 = vadd.f32 1e-05, %v557_v42  ;;  %v483_v18 = vsub.f32 %v1949_v51, %v467_v43  ;;  %v786_v52 = vadd.f32 %v2010_v54, %v766_v46 }
 0x1cb   :  { %v610_v53 = vmul.f32 %v1509_v19, %v609_v47  ;;  %v616_v20 = vmul.f32 %v1511_v48, %v572_v11  ;;  %vm622_vm10 = vweird.f32 %v1511_v48 }
 0x1cc   :  { %1512 = vrsqrt.f32 %v573_v50  ;;  %802 = vst [vmem:[#allocation11 + $0x8] sm:$0xff] %v786_v52  ;;  %v817_v40 = vpack.c.bf16 %v786_v52, %v785_v25  ;;  %v2030_v56 = vmul.f32 %v1841_v22, %v483_v18  ;;  %vm623_vm12 = vmor %vm621_vm11, %vm622_vm10  ;;  %vm631_vm14 = vweird.f32 %v573_v50 }
 0x1cd   :  { %v617_v23 = vmul.f32 %v1511_v48, %v616_v20  ;;  %v614_v57 = vsel %vm613_vm9, %v1509_v19, %v610_v53 }
 0x1ce   :  { %901 = vmatmul.bf16.vlgmr.msra.gmra.mxu1 %v817_v40  ;;  %v515_v59 = vmul.f32 %v2030_v56, %v2030_v56  ;;  %v747_v51 = vmul.f32 %v614_v57, %v1922_v30 }
 0x1cf   :  { %v618_v62 = vmul.f32 0.5, %v617_v23  ;;  %v532_v3 = vpop.xlane.xlu0 %531 }
 0x1d0   :  { %v558_v44 = vmul.f32 0.03125, %v532_v3  ;;  %541 = vadd.xlane.f32.xlu0 %v515_v59  ;;  %v767_v61 = vmul.f32 %v1999_v4, %v747_v51 }
 0x1d1   :  { %v619_v5 = vsub.f32 1.5, %v618_v62 }
 0x1d2   :  { %v1513_v49 = vpop.eup %1512  ;;  %v574_v34 = vadd.f32 1e-05, %v558_v44  ;;  %v787_v22 = vadd.f32 %v2010_v54, %v767_v61 }
 0x1d3   :  { %v620_v8 = vmul.f32 %v1511_v48, %v619_v5  ;;  %v626_v9 = vmul.f32 %v1513_v49, %v573_v50  ;;  %vm632_vm13 = vweird.f32 %v1513_v49 }
 0x1d4   :  { %1514 = vrsqrt.f32 %v574_v34  ;;  %803 = vst [vmem:[#allocation11 + $0x10] sm:$0xff] %v787_v22  ;;  %vm633_vm15 = vmor %vm631_vm14, %vm632_vm13  ;;  %vm641_vm1 = vweird.f32 %v574_v34 }
 0x1d5   :  { %v627_v10 = vmul.f32 %v1513_v49, %v626_v9  ;;  %v624_v30 = vsel %vm623_vm12, %v1511_v48, %v620_v8 }
 0x1d6   :  { %v748_v13 = vmul.f32 %v624_v30, %v1936_v41 }
 0x1d7   :  { %v628_v14 = vmul.f32 0.5, %v627_v10  ;;  %v534_v58 = vpop.xlane.xlu1 %533 }
 0x1d8   :  { %v559_v15 = vmul.f32 0.03125, %v534_v58  ;;  %v768_v16 = vmul.f32 %v1999_v4, %v748_v13 }
 0x1d9   :  { %v629_v7 = vsub.f32 1.5, %v628_v14 }
 0x1da   :  { %v1515_v0 = vpop.eup %1514  ;;  %v575_v19 = vadd.f32 1e-05, %v559_v15  ;;  %v788_v21 = vadd.f32 %v2010_v54, %v768_v16 }
 0x1db   :  { %v630_v11 = vmul.f32 %v1513_v49, %v629_v7  ;;  %v636_v25 = vmul.f32 %v1515_v0, %v574_v34  ;;  %vm642_vm0 = vweird.f32 %v1515_v0 }
 0x1dc   :  { %1516 = vrsqrt.f32 %v575_v19  ;;  %804 = vst [vmem:[#allocation11 + $0x18] sm:$0xff] %v788_v21  ;;  %v818_v26 = vpack.c.bf16 %v788_v21, %v787_v22  ;;  %vm643_vm2 = vmor %vm641_vm1, %vm642_vm0  ;;  %vm651_vm4 = vweird.f32 %v575_v19 }
 0x1dd   :  { %v637_v27 = vmul.f32 %v1515_v0, %v636_v25  ;;  %v634_v41 = vsel %vm633_vm15, %v1513_v49, %v630_v11 }
 0x1de   :  { %906 = vmatmul.bf16.gmra.mxu1 %v818_v26  ;;  %v749_v28 = vmul.f32 %v634_v41, %v1944_v36 }
 0x1df   :  { %v638_v31 = vmul.f32 0.5, %v637_v27  ;;  %v536_v32 = vpop.xlane.xlu2 %535 }
 0x1e0   :  { %v560_v33 = vmul.f32 0.03125, %v536_v32  ;;  %v769_v35 = vmul.f32 %v1999_v4, %v749_v28 }
 0x1e1   :  { %v639_v37 = vsub.f32 1.5, %v638_v31 }
 0x1e2   :  { %v1517_v38 = vpop.eup %1516  ;;  %v576_v39 = vadd.f32 1e-05, %v560_v33  ;;  %v789_v42 = vadd.f32 %v2010_v54, %v769_v35 }
 0x1e3   :  { %v640_v43 = vmul.f32 %v1515_v0, %v639_v37  ;;  %v646_v46 = vmul.f32 %v1517_v38, %v575_v19  ;;  %vm652_vm3 = vweird.f32 %v1517_v38 }
 0x1e4   :  { %1518 = vrsqrt.f32 %v576_v39  ;;  %805 = vst [vmem:[#allocation11 + $0x20] sm:$0xff] %v789_v42  ;;  %vm653_vm5 = vmor %vm651_vm4, %vm652_vm3  ;;  %vm661_vm7 = vweird.f32 %v576_v39 }
 0x1e5   :  { %v647_v47 = vmul.f32 %v1517_v38, %v646_v46  ;;  %v644_v48 = vsel %vm643_vm2, %v1515_v0, %v640_v43  ;;  %v1461_v43 = vld [vmem:[#allocation9 + $0x28] sm:$0xff]  ;;  %v1460_v46 = vld [vmem:[#allocation9 + $0x20] sm:$0xff] }
 0x1e6   :  { %v750_v36 = vmul.f32 %v644_v48, %v1954_v55 }
 0x1e7   :  { %v648_v50 = vmul.f32 0.5, %v647_v47  ;;  %v546_v18 = vpop.xlane.xlu0 %545 }
 0x1e8   :  { %v565_v52 = vmul.f32 0.03125, %v546_v18  ;;  %v770_v53 = vmul.f32 %v1999_v4, %v750_v36  ;;  %v1458_v36 = vld [vmem:[#allocation9 + $0x10] sm:$0xff]  ;;  %v1457_v18 = vld [vmem:[#allocation9 + $0x8] sm:$0xff] }
 0x1e9   :  { %v649_v20 = vsub.f32 1.5, %v648_v50 }
 0x1ea   :  { %v1519_v40 = vpop.eup %1518  ;;  %v581_v23 = vadd.f32 1e-05, %v565_v52  ;;  %v790_v57 = vadd.f32 %v2010_v54, %v770_v53 }
 0x1eb   :  { %v650_v59 = vmul.f32 %v1517_v38, %v649_v20  ;;  %v656_v51 = vmul.f32 %v1519_v40, %v576_v39  ;;  %vm662_vm6 = vweird.f32 %v1519_v40  ;;  %v1463_v39 = vld [vmem:[#allocation9 + $0x38] sm:$0xff] }
 0x1ec   :  { %1520 = vrsqrt.f32 %v581_v23  ;;  %806 = vst [vmem:[#allocation11 + $0x28] sm:$0xff] %v790_v57  ;;  %v819_v62 = vpack.c.bf16 %v790_v57, %v789_v42  ;;  %vm663_vm8 = vmor %vm661_vm7, %vm662_vm6  ;;  %vm711_vm10 = vweird.f32 %v581_v23  ;;  %1018 = vmatpush.bf16.msra.mxu2 %v1463_v39  ;;  %1480 = vmatpush.bf16.msra.mxu3 %v1463_v39  ;;  %v1462_v42 = vld [vmem:[#allocation9 + $0x30] sm:$0xff] }
 0x1ed   :  { %v657_v3 = vmul.f32 %v1519_v40, %v656_v51  ;;  %v654_v55 = vsel %vm653_vm5, %v1517_v38, %v650_v59 }
 0x1ee   :  { %911 = vmatmul.bf16.gmra.mxu1 %v819_v62  ;;  %v751_v44 = vmul.f32 %v654_v55, %v1960_v60 }
 0x1ef   :  { %v658_v61 = vmul.f32 0.5, %v657_v3  ;;  %v540_v5 = vpop.xlane.xlu0 %539 }
 0x1f0   :  { %v562_v49 = vmul.f32 0.03125, %v540_v5  ;;  %v771_v34 = vmul.f32 %v1999_v4, %v751_v44  ;;  %1019 = vmatpush.bf16.msra.mxu2 %v1462_v42  ;;  %1481 = vmatpush.bf16.msra.mxu3 %v1462_v42 }
 0x1f1   :  { %v659_v22 = vsub.f32 1.5, %v658_v61 }
 0x1f2   :  { %v1521_v8 = vpop.eup %1520  ;;  %v578_v9 = vadd.f32 1e-05, %v562_v49  ;;  %v791_v10 = vadd.f32 %v2010_v54, %v771_v34 }
 0x1f3   :  { %v660_v30 = vmul.f32 %v1519_v40, %v659_v22  ;;  %v706_v13 = vmul.f32 %v1521_v8, %v581_v23  ;;  %vm712_vm9 = vweird.f32 %v1521_v8  ;;  %v1456_v23 = vld [vmem:[#allocation9] sm:$0xff] }
 0x1f4   :  { %1522 = vrsqrt.f32 %v578_v9  ;;  %807 = vst [vmem:[#allocation11 + $0x30] sm:$0xff] %v791_v10  ;;  %vm713_vm11 = vmor %vm711_vm10, %vm712_vm9  ;;  %vm681_vm13 = vweird.f32 %v578_v9  ;;  %1020 = vmatpush.bf16.msra.mxu2 %v1461_v43  ;;  %1482 = vmatpush.bf16.msra.mxu3 %v1461_v43 }
 0x1f5   :  { %v707_v14 = vmul.f32 %v1521_v8, %v706_v13  ;;  %v664_v58 = vsel %vm663_vm8, %v1519_v40, %v660_v30 }
 0x1f6   :  { %v752_v60 = vmul.f32 %v664_v58, %v1966_v1 }
 0x1f7   :  { %v708_v15 = vmul.f32 0.5, %v707_v14 }
 0x1f8   :  { %v772_v16 = vmul.f32 %v1999_v4, %v752_v60  ;;  %1021 = vmatpush.bf16.msra.mxu2 %v1460_v46  ;;  %1483 = vmatpush.bf16.msra.mxu3 %v1460_v46 }
 0x1f9   :  { %v709_v7 = vsub.f32 1.5, %v708_v15 }
 0x1fa   :  { %v1523_v0 = vpop.eup %1522  ;;  %v792_v19 = vadd.f32 %v2010_v54, %v772_v16 }
 0x1fb   :  { %v710_v21 = vmul.f32 %v1521_v8, %v709_v7  ;;  %v676_v11 = vmul.f32 %v1523_v0, %v578_v9  ;;  %vm682_vm12 = vweird.f32 %v1523_v0 }
 0x1fc   :  { %808 = vst [vmem:[#allocation11 + $0x38] sm:$0xff] %v792_v19  ;;  %v820_v25 = vpack.c.bf16 %v792_v19, %v791_v10  ;;  %vm683_vm14 = vmor %vm681_vm13, %vm682_vm12 }
 0x1fd   :  { %v714_v26 = vsel %vm713_vm11, %v1521_v8, %v710_v21  ;;  %v677_v27 = vmul.f32 %v1523_v0, %v676_v11 }
 0x1fe   :  { %v757_v41 = vmul.f32 %v714_v26, %v1972_v6  ;;  %916 = vmatmul.bf16.gmra.mxu1 %v820_v25 }
 0x1ff   :  { %v678_v1 = vmul.f32 0.5, %v677_v27 }
 0x200   :  { %v777_v28 = vmul.f32 %v1999_v4, %v757_v41 }
 0x201   :  { %v679_v31 = vsub.f32 1.5, %v678_v1 }
 0x202   :  { %v2055_v32 = vadd.f32 %v2010_v54, %v777_v28 }
 0x203   :  { %v680_v33 = vmul.f32 %v1523_v0, %v679_v31 }
 0x204   :  { %813 = vst [vmem:[#allocation11 + $0x60] sm:$0xff] %v2055_v32 }
 0x205   :  { %v684_v35 = vsel %vm683_vm14, %v1523_v0, %v680_v33 }
 0x206   :  { %v754_v37 = vmul.f32 %v684_v35, %v1978_v12  ;;  %v1459_v12 = vld [vmem:[#allocation9 + $0x18] sm:$0xff] }
 0x207   :  { %1022 = vmatpush.bf16.msra.mxu2 %v1459_v12  ;;  %1484 = vmatpush.bf16.msra.mxu3 %v1459_v12 }
 0x208   :  { %v774_v38 = vmul.f32 %v1999_v4, %v754_v37 }
 0x20a   :  { %v2061_v6 = vadd.f32 %v2010_v54, %v774_v38 }
 0x20b   :  { %1023 = vmatpush.bf16.msra.mxu2 %v1458_v36  ;;  %1485 = vmatpush.bf16.msra.mxu3 %v1458_v36 }
 0x20c   :  { %810 = vst [vmem:[#allocation11 + $0x48] sm:$0xff] %v2061_v6 }
 0x20f   :  { %1024 = vmatpush.bf16.msra.mxu2 %v1457_v18  ;;  %1486 = vmatpush.bf16.msra.mxu3 %v1457_v18 }
 0x213   :  { %1025 = vmatpush.bf16.msra.mxu2 %v1456_v23  ;;  %1487 = vmatpush.bf16.msra.mxu3 %v1456_v23 }
 0x22b   :  { %v548_v47 = vpop.xlane.xlu1 %547 }
 0x22c   :  { %v566_v48 = vmul.f32 0.03125, %v548_v47 }
 0x22e   :  { %v582_v50 = vadd.f32 1e-05, %v566_v48 }
 0x230   :  { %1524 = vrsqrt.f32 %v582_v50  ;;  %vm721_vm0 = vweird.f32 %v582_v50 }
 0x233   :  { %v538_v52 = vpop.xlane.xlu2 %537  ;;  %v550_v53 = vpop.xlane.xlu1 %549 }
 0x234   :  { %v561_v20 = vmul.f32 0.03125, %v538_v52  ;;  %v567_v40 = vmul.f32 0.03125, %v550_v53 }
 0x236   :  { %v1525_v57 = vpop.eup %1524  ;;  %v577_v59 = vadd.f32 1e-05, %v561_v20  ;;  %v583_v51 = vadd.f32 1e-05, %v567_v40 }
 0x237   :  { %v716_v62 = vmul.f32 %v1525_v57, %v582_v50  ;;  %vm722_vm15 = vweird.f32 %v1525_v57 }
 0x238   :  { %1526 = vrsqrt.f32 %v577_v59  ;;  %vm723_vm1 = vmor %vm721_vm0, %vm722_vm15  ;;  %vm671_vm4 = vweird.f32 %v577_v59  ;;  %vm731_vm6 = vweird.f32 %v583_v51 }
 0x239   :  { %v717_v3 = vmul.f32 %v1525_v57, %v716_v62  ;;  %1528 = vrsqrt.f32 %v583_v51 }
 0x23b   :  { %v718_v55 = vmul.f32 0.5, %v717_v3  ;;  %v552_v44 = vpop.xlane.xlu2 %551  ;;  %v544_v61 = vpop.xlane.xlu1 %543 }
 0x23c   :  { %v568_v5 = vmul.f32 0.03125, %v552_v44  ;;  %v564_v49 = vmul.f32 0.03125, %v544_v61 }
 0x23d   :  { %v719_v34 = vsub.f32 1.5, %v718_v55 }
 0x23e   :  { %v1527_v22 = vpop.eup %1526  ;;  %v584_v8 = vadd.f32 1e-05, %v568_v5  ;;  %v2064_v9 = vadd.f32 1e-05, %v564_v49 }
 0x23f   :  { %v1529_v10 = vpop.eup %1528  ;;  %v720_v30 = vmul.f32 %v1525_v57, %v719_v34  ;;  %v666_v13 = vmul.f32 %v1527_v22, %v577_v59  ;;  %vm672_vm2 = vweird.f32 %v1527_v22 }
 0x240   :  { %v726_v14 = vmul.f32 %v1529_v10, %v583_v51  ;;  %1530 = vrsqrt.f32 %v584_v8  ;;  %vm732_vm3 = vweird.f32 %v1529_v10  ;;  %vm673_vm5 = vmor %vm671_vm4, %vm672_vm2  ;;  %vm741_vm10 = vweird.f32 %v584_v8 }
 0x241   :  { %v724_v58 = vsel %vm723_vm1, %v1525_v57, %v720_v30  ;;  %v667_v60 = vmul.f32 %v1527_v22, %v666_v13  ;;  %1532 = vrsqrt.f32 %v2064_v9  ;;  %vm733_vm7 = vmor %vm731_vm6, %vm732_vm3  ;;  %vm701_vm12 = vweird.f32 %v2064_v9  ;;  %v2086_v57 = vld [vmem:[%s2303_s6] ss:$0 sm:$0xff] }
 0x242   :  { %v758_v15 = vmul.f32 %v724_v58, %v1984_v45  ;;  %v727_v16 = vmul.f32 %v1529_v10, %v726_v14  ;;  %vm1067_vm1 = vcmp.lt.s32.totalorder %v1832_v17, 4 }
 0x243   :  { %v668_v7 = vmul.f32 0.5, %v667_v60  ;;  %v542_v0 = vpop.xlane.xlu0 %541 }
 0x244   :  { %v728_v19 = vmul.f32 0.5, %v727_v16  ;;  %v563_v21 = vmul.f32 0.03125, %v542_v0  ;;  %v778_v11 = vmul.f32 %v1999_v4, %v758_v15 }
 0x245   :  { %v669_v25 = vsub.f32 1.5, %v668_v7 }
 0x246   :  { %v1531_v26 = vpop.eup %1530  ;;  %v729_v27 = vsub.f32 1.5, %v728_v19  ;;  %v2069_v41 = vadd.f32 1e-05, %v563_v21  ;;  %v798_v1 = vadd.f32 %v2010_v54, %v778_v11 }
 0x247   :  { %v1533_v28 = vpop.eup %1532  ;;  %v670_v31 = vmul.f32 %v1527_v22, %v669_v25  ;;  %v736_v45 = vmul.f32 %v1531_v26, %v584_v8  ;;  %vm742_vm8 = vweird.f32 %v1531_v26 }
 0x248   :  { %v730_v33 = vmul.f32 %v1529_v10, %v729_v27  ;;  %v696_v35 = vmul.f32 %v1533_v28, %v2064_v9  ;;  %1534 = vrsqrt.f32 %v2069_v41  ;;  %814 = vst [vmem:[#allocation11 + $0x68] sm:$0xff] %v798_v1  ;;  %v823_v38 = vpack.c.bf16 %v798_v1, %v2055_v32  ;;  %vm743_vm11 = vmor %vm741_vm10, %vm742_vm8 }
 0x249   :  { %v737_v37 = vmul.f32 %v1531_v26, %v736_v45  ;;  %v674_v39 = vsel %vm673_vm5, %v1527_v22, %v670_v31  ;;  %vm702_vm9 = vweird.f32 %v1533_v28  ;;  %vm691_vm15 = vweird.f32 %v2069_v41 }
 0x24a   :  { %v697_v42 = vmul.f32 %v1533_v28, %v696_v35  ;;  %v753_v43 = vmul.f32 %v674_v39, %v1994_v2  ;;  %v734_v46 = vsel %vm733_vm7, %v1529_v10, %v730_v33  ;;  %931 = vmatmul.bf16.vlgmr.msrb.gmra.mxu3 %v823_v38  ;;  %vm703_vm13 = vmor %vm701_vm12, %vm702_vm9 }
 0x24b   :  { %v738_v12 = vmul.f32 0.5, %v737_v37  ;;  %v902_v47 = vpop.f32.mrf.mxu1  ;;  %v759_v48 = vmul.f32 %v734_v46, %v1991_v63 }
 0x24c   :  { %v698_v36 = vmul.f32 0.5, %v697_v42  ;;  %v773_v50 = vmul.f32 %v1999_v4, %v753_v43  ;;  %v903_v49 = vadd.f32 %v2086_v57, %v902_v47  ;;  %v2114_v43 = vld [vmem:[%s2305_s8] ss:$0 sm:$0xff]  ;;  %s1761_s8 = smov [#allocation11]  }
 0x24d   :  { %v739_v18 = vsub.f32 1.5, %v738_v12  ;;  %v779_v52 = vmul.f32 %v1999_v4, %v759_v48  ;;  %s1266_s17 = sshll.u32 %s1761_s8, 4  ;;  %s1267_s17 = int_to_ptr.vmem [resolvable:$true] %s1266_s17 }
 0x24e   :  { %v1535_v53 = vpop.eup %1534  ;;  %v699_v20 = vsub.f32 1.5, %v698_v36  ;;  %v793_v32 = vadd.f32 %v2010_v54, %v773_v50 }
 0x24f   :  { %v740_v40 = vmul.f32 %v1531_v26, %v739_v18  ;;  %v686_v2 = vmul.f32 %v1535_v53, %v2069_v41  ;;  %v799_v23 = vadd.f32 %v2010_v54, %v779_v52  ;;  %vm692_vm14 = vweird.f32 %v1535_v53 }
 0x250   :  { %v700_v63 = vmul.f32 %v1533_v28, %v699_v20  ;;  %809 = vst [vmem:[#allocation11 + $0x40] sm:$0xff] %v793_v32  ;;  %v821_v59 = vpack.c.bf16 %v2061_v6, %v793_v32  ;;  %vm693_vm0 = vmor %vm691_vm15, %vm692_vm14 }
 0x251   :  { %v687_v51 = vmul.f32 %v1535_v53, %v686_v2  ;;  %v744_v62 = vsel %vm743_vm11, %v1531_v26, %v740_v40  ;;  %815 = vst [vmem:[#allocation11 + $0x70] sm:$0xff] %v799_v23 }
 0x252   :  { %921 = vmatmul.bf16.gmra.mxu1 %v821_v59  ;;  %v760_v3 = vmul.f32 %v744_v62, %v2019_v29  ;;  %v704_v55 = vsel %vm703_vm13, %v1533_v28, %v700_v63 }
 0x253   :  { %v688_v44 = vmul.f32 0.5, %v687_v51  ;;  %v904_v61 = vpop.f32.mrf.mxu1  ;;  %v756_v5 = vmul.f32 %v704_v55, %v2015_v24 }
 0x254   :  { %v905_v34 = vadd.f32 %v2086_v57, %v904_v61  ;;  %v780_v22 = vmul.f32 %v1999_v4, %v760_v3 }
 0x255   :  { %v689_v8 = vsub.f32 1.5, %v688_v44  ;;  %v776_v6 = vmul.f32 %v1999_v4, %v756_v5 }
 0x256   :  { %v942_v9 = vpack.c.bf16 %v905_v34, %v903_v49  ;;  %v800_v10 = vadd.f32 %v2010_v54, %v780_v22 }
 0x257   :  { %v690_v30 = vmul.f32 %v1535_v53, %v689_v8  ;;  %v796_v29 = vadd.f32 %v2010_v54, %v776_v6 }
 0x258   :  { %1026 = vmatmul.bf16.vlgmr.msra.gmra.mxu2 %v942_v9  ;;  %816 = vst [vmem:[#allocation11 + $0x78] sm:$0xff] %v800_v10  ;;  %v824_v24 = vpack.c.bf16 %v800_v10, %v799_v23 }
 0x259   :  { %v694_v13 = vsel %vm693_vm0, %v1535_v53, %v690_v30  ;;  %812 = vst [vmem:[#allocation11 + $0x58] sm:$0xff] %v796_v29 }
 0x25a   :  { %v755_v14 = vmul.f32 %v694_v13, %v2030_v56  ;;  %936 = vmatmul.bf16.gmra.mxu3 %v824_v24 }
 0x25b   :  { %v907_v58 = vpop.f32.mrf.mxu1 }
 0x25c   :  { %v775_v60 = vmul.f32 %v1999_v4, %v755_v14  ;;  %v908_v0 = vadd.f32 %v2086_v57, %v907_v58 }
 0x25e   :  { %v795_v15 = vadd.f32 %v2010_v54, %v775_v60 }
 0x260   :  { %811 = vst [vmem:[#allocation11 + $0x50] sm:$0xff] %v795_v15  ;;  %v822_v16 = vpack.c.bf16 %v796_v29, %v795_v15 }
 0x261   :  { %1274 = dma.vmem_to_hbm [thread:$0]  %s1267_s17, 2048, %s1269_s20, [#allocation5], %s1762_s21, %s1762_s21, %s1763_s22  }
 0x262   :  { %926 = vmatmul.bf16.gmra.mxu1 %v822_v16 }
 0x263   :  { %v909_v7 = vpop.f32.mrf.mxu1 }
 0x264   :  { %v910_v19 = vadd.f32 %v2086_v57, %v909_v7 }
 0x266   :  { %v943_v21 = vpack.c.bf16 %v910_v19, %v908_v0 }
 0x268   :  { %1031 = vmatmul.bf16.gmra.mxu2 %v943_v21 }
 0x26b   :  { %v912_v11 = vpop.f32.mrf.mxu1 }
 0x26c   :  { %v913_v56 = vadd.f32 %v2086_v57, %v912_v11 }
 0x273   :  { %v914_v25 = vpop.f32.mrf.mxu1 }
 0x274   :  { %v915_v26 = vadd.f32 %v2086_v57, %v914_v25 }
 0x276   :  { %v944_v27 = vpack.c.bf16 %v915_v26, %v913_v56 }
 0x278   :  { %1036 = vmatmul.bf16.gmra.mxu2 %v944_v27 }
 0x27b   :  { %v917_v4 = vpop.f32.mrf.mxu1 }
 0x27c   :  { %v918_v41 = vadd.f32 %v2086_v57, %v917_v4 }
 0x283   :  { %v919_v54 = vpop.f32.mrf.mxu1 }
 0x284   :  { %v920_v1 = vadd.f32 %v2086_v57, %v919_v54 }
 0x286   :  { %v945_v28 = vpack.c.bf16 %v920_v1, %v918_v41 }
 0x288   :  { %1041 = vmatmul.bf16.gmra.mxu2 %v945_v28 }
 0x2cd   :  { %v932_v31 = vpop.f32.mrf.mxu3 }
 0x2ce   :  { %v933_v35 = vadd.f32 %v2086_v57, %v932_v31 }
 0x2cf   :  { %v922_v45 = vpop.f32.mrf.mxu1 }
 0x2d0   :  { %v923_v39 = vadd.f32 %v2086_v57, %v922_v45 }
 0x2d5   :  { %v934_v33 = vpop.f32.mrf.mxu3 }
 0x2d6   :  { %v935_v37 = vadd.f32 %v2086_v57, %v934_v33 }
 0x2d7   :  { %v924_v38 = vpop.f32.mrf.mxu1 }
 0x2d8   :  { %v925_v42 = vadd.f32 %v2086_v57, %v924_v38  ;;  %v948_v46 = vpack.c.bf16 %v935_v37, %v933_v35 }
 0x2da   :  { %v946_v12 = vpack.c.bf16 %v925_v42, %v923_v39  ;;  %1056 = vmatmul.bf16.vlgmr.msra.gmra.mxu3 %v948_v46 }
 0x2db   :  { %v1027_v47 = vpop.f32.mrf.mxu2 }
 0x2dc   :  { %v1028_v48 = vadd.f32 %v2114_v43, %v1027_v47  ;;  %1046 = vmatmul.bf16.gmra.mxu2 %v946_v12 }
 0x2dd   :  { %v937_v36 = vpop.f32.mrf.mxu3 }
 0x2de   :  { %v1070_v50 = vsel %vm1067_vm1, %v1028_v48, -1e+30  ;;  %v938_v40 = vadd.f32 %v2086_v57, %v937_v36 }
 0x2df   :  { %1086 = vmax.xlane.f32.xlu2 %v1070_v50  ;;  %v927_v18 = vpop.f32.mrf.mxu1 }
 0x2e0   :  { %v928_v63 = vadd.f32 %v2086_v57, %v927_v18 }
 0x2e3   :  { %v1029_v52 = vpop.f32.mrf.mxu2 }
 0x2e4   :  { %v1030_v53 = vadd.f32 %v2114_v43, %v1029_v52 }
 0x2e5   :  { %v939_v20 = vpop.f32.mrf.mxu3 }
 0x2e6   :  { %v2123_v32 = vsel %vm1067_vm1, %v1030_v53, -1e+30  ;;  %v940_v2 = vadd.f32 %v2086_v57, %v939_v20 }
 0x2e7   :  { %1088 = vmax.xlane.f32.xlu0 %v2123_v32  ;;  %v929_v23 = vpop.f32.mrf.mxu1 }
 0x2e8   :  { %v930_v59 = vadd.f32 %v2086_v57, %v929_v23  ;;  %v949_v51 = vpack.c.bf16 %v940_v2, %v938_v40 }
 0x2ea   :  { %v947_v62 = vpack.c.bf16 %v930_v59, %v928_v63  ;;  %1061 = vmatmul.bf16.gmra.mxu3 %v949_v51 }
 0x2eb   :  { %v1032_v3 = vpop.f32.mrf.mxu2 }
 0x2ec   :  { %v1033_v55 = vadd.f32 %v2114_v43, %v1032_v3  ;;  %1051 = vmatmul.bf16.gmra.mxu2 %v947_v62 }
 0x2ee   :  { %v1072_v44 = vsel %vm1067_vm1, %v1033_v55, -1e+30 }
 0x2ef   :  { %1090 = vmax.xlane.f32.xlu1 %v1072_v44 }
 0x2f3   :  { %v1034_v61 = vpop.f32.mrf.mxu2 }
 0x2f4   :  { %v1035_v15 = vadd.f32 %v2114_v43, %v1034_v61 }
 0x2f6   :  { %v2163_v0 = vsel %vm1067_vm1, %v1035_v15, -1e+30 }
 0x2fb   :  { %v1037_v5 = vpop.f32.mrf.mxu2 }
 0x2fc   :  { %v1038_v49 = vadd.f32 %v2114_v43, %v1037_v5 }
 0x2fe   :  { %v2136_v34 = vsel %vm1067_vm1, %v1038_v49, -1e+30 }
 0x2ff   :  { %1094 = vmax.xlane.f32.xlu0 %v2136_v34 }
 0x303   :  { %v1039_v57 = vpop.f32.mrf.mxu2 }
 0x304   :  { %v1040_v22 = vadd.f32 %v2114_v43, %v1039_v57 }
 0x306   :  { %v1075_v8 = vsel %vm1067_vm1, %v1040_v22, -1e+30 }
 0x307   :  { %1096 = vmax.xlane.f32.xlu1 %v1075_v8 }
 0x30b   :  { %v1042_v6 = vpop.f32.mrf.mxu2 }
 0x30c   :  { %v1043_v19 = vadd.f32 %v2114_v43, %v1042_v6 }
 0x30e   :  { %v2170_v26 = vsel %vm1067_vm1, %v1043_v19, -1e+30 }
 0x313   :  { %v1044_v9 = vpop.f32.mrf.mxu2 }
 0x314   :  { %v1045_v10 = vadd.f32 %v2114_v43, %v1044_v9 }
 0x316   :  { %v2145_v30 = vsel %vm1067_vm1, %v1045_v10, -1e+30 }
 0x317   :  { %1100 = vmax.xlane.f32.xlu0 %v2145_v30 }
 0x352   :  { %v1087_v56 = vpop.xlane.xlu2 %1086 }
 0x353   :  { %v2178_v4 = vsub.f32 %v1070_v50, %v1087_v56 }
 0x355   :  { %v1134_v28 = vmul.f32 1.442695, %v2178_v4 }
 0x357   :  { %1536 = vpow2.f32 %v1134_v28 }
 0x35a   :  { %v1089_v33 = vpop.xlane.xlu0 %1088 }
 0x35b   :  { %v2202_v46 = vsub.f32 %v2123_v32, %v1089_v33 }
 0x35d   :  { %v1057_v29 = vpop.f32.mrf.mxu3  ;;  %v1136_v36 = vmul.f32 1.442695, %v2202_v46  ;;  %v1537_v53 = vpop.eup %1536 }
 0x35e   :  { %v1058_v24 = vadd.f32 %v2114_v43, %v1057_v29 }
 0x35f   :  { %v1047_v13 = vpop.f32.mrf.mxu2 }
 0x360   :  { %v1048_v14 = vadd.f32 %v2114_v43, %v1047_v13  ;;  %v2152_v58 = vsel %vm1067_vm1, %v1058_v24, -1e+30 }
 0x361   :  { %1110 = vmax.xlane.f32.xlu2 %v2152_v58 }
 0x362   :  { %v2157_v60 = vsel %vm1067_vm1, %v1048_v14, -1e+30  ;;  %v1091_v31 = vpop.xlane.xlu1 %1090 }
 0x363   :  { %1102 = vmax.xlane.f32.xlu1 %v2157_v60  ;;  %v2197_v42 = vsub.f32 %v1072_v44, %v1091_v31 }
 0x365   :  { %v1059_v16 = vpop.f32.mrf.mxu3  ;;  %v1138_v48 = vmul.f32 1.442695, %v2197_v42 }
 0x366   :  { %v1060_v41 = vadd.f32 %v2114_v43, %v1059_v16 }
 0x367   :  { %v1049_v7 = vpop.f32.mrf.mxu2  ;;  %1538 = vpow2.f32 %v1138_v48 }
 0x368   :  { %v1050_v54 = vadd.f32 %v2114_v43, %v1049_v7  ;;  %v2195_v39 = vsel %vm1067_vm1, %v1060_v41, -1e+30  ;;  %1540 = vpow2.f32 %v1136_v36 }
 0x369   :  { %1092 = vmax.xlane.f32.xlu2 %v2163_v0 }
 0x36a   :  { %v2186_v35 = vsel %vm1067_vm1, %v1050_v54, -1e+30 }
 0x36d   :  { %v1062_v11 = vpop.f32.mrf.mxu3  ;;  %v1539_v23 = vpop.eup %1538 }
 0x36e   :  { %v1063_v47 = vadd.f32 %v2114_v43, %v1062_v11  ;;  %v1541_v63 = vpop.eup %1540 }
 0x36f   :  { %v1052_v21 = vpop.f32.mrf.mxu2 }
 0x370   :  { %v1053_v25 = vadd.f32 %v2114_v43, %v1052_v21  ;;  %v2215_v20 = vsel %vm1067_vm1, %v1063_v47, -1e+30 }
 0x371   :  { %1098 = vmax.xlane.f32.xlu2 %v2170_v26 }
 0x372   :  { %v2175_v27 = vsel %vm1067_vm1, %v1053_v25, -1e+30  ;;  %v1095_v18 = vpop.xlane.xlu0 %1094 }
 0x373   :  { %1106 = vmax.xlane.f32.xlu0 %v2175_v27 }
 0x375   :  { %v1064_v37 = vpop.f32.mrf.mxu3 }
 0x376   :  { %v1065_v12 = vadd.f32 %v2114_v43, %v1064_v37 }
 0x377   :  { %v1054_v1 = vpop.f32.mrf.mxu2 }
 0x378   :  { %v1055_v45 = vadd.f32 %v2114_v43, %v1054_v1  ;;  %v2210_v52 = vsel %vm1067_vm1, %v1065_v12, -1e+30  ;;  %v2221_v43 = vsub.f32 %v2136_v34, %v1095_v18 }
 0x379   :  { %1104 = vmax.xlane.f32.xlu2 %v2186_v35 }
 0x37a   :  { %v2191_v38 = vsel %vm1067_vm1, %v1055_v45, -1e+30  ;;  %v1097_v50 = vpop.xlane.xlu1 %1096  ;;  %v1142_v2 = vmul.f32 1.442695, %v2221_v43 }
 0x37b   :  { %1108 = vmax.xlane.f32.xlu1 %v2191_v38  ;;  %1112 = vmax.xlane.f32.xlu0 %v2195_v39  ;;  %v2217_v32 = vsub.f32 %v1075_v8, %v1097_v50 }
 0x37d   :  { %v1144_v40 = vmul.f32 1.442695, %v2217_v32 }
 0x37f   :  { %1542 = vpow2.f32 %v1144_v40 }
 0x380   :  { %1544 = vpow2.f32 %v1142_v2 }
 0x381   :  { %1116 = vmax.xlane.f32.xlu2 %v2210_v52 }
 0x383   :  { %1114 = vmax.xlane.f32.xlu1 %v2215_v20  ;;  %1166 = vadd.xlane.f32.xlu0 %v1537_v53 }
 0x385   :  { %v1543_v62 = vpop.eup %1542 }
 0x386   :  { %v1545_v3 = vpop.eup %1544 }
 0x389   :  { %1170 = vadd.xlane.f32.xlu2 %v1539_v23 }
 0x38a   :  { %v1101_v17 = vpop.xlane.xlu0 %1100 }
 0x38b   :  { %1168 = vadd.xlane.f32.xlu1 %v1541_v63  ;;  %v2226_v59 = vsub.f32 %v2145_v30, %v1101_v17 }
 0x38d   :  { %v1148_v51 = vmul.f32 1.442695, %v2226_v59 }
 0x38f   :  { %1546 = vpow2.f32 %v1148_v51 }
 0x391   :  { %1176 = vadd.xlane.f32.xlu2 %v1543_v62 }
 0x393   :  { %1174 = vadd.xlane.f32.xlu1 %v1545_v3 }
 0x395   :  { %v1547_v55 = vpop.eup %1546 }
 0x39b   :  { %1180 = vadd.xlane.f32.xlu1 %v1547_v55 }
 0x3d4   :  { %v1111_v44 = vpop.xlane.xlu2 %1110 }
 0x3d5   :  { %v2230_v61 = vsub.f32 %v2152_v58, %v1111_v44 }
 0x3d6   :  { %v1103_v5 = vpop.xlane.xlu1 %1102 }
 0x3d7   :  { %v2233_v49 = vsub.f32 %v2157_v60, %v1103_v5  ;;  %v1158_v34 = vmul.f32 1.442695, %v2230_v61 }
 0x3d9   :  { %v1150_v57 = vmul.f32 1.442695, %v2233_v49  ;;  %1548 = vpow2.f32 %v1158_v34 }
 0x3db   :  { %1550 = vpow2.f32 %v1150_v57 }
 0x3dc   :  { %v1093_v22 = vpop.xlane.xlu2 %1092 }
 0x3dd   :  { %v2238_v8 = vsub.f32 %v2163_v0, %v1093_v22 }
 0x3df   :  { %v1549_v6 = vpop.eup %1548  ;;  %v1140_v9 = vmul.f32 1.442695, %v2238_v8 }
 0x3e0   :  { %1190 = vadd.xlane.f32.xlu0 %v1549_v6 }
 0x3e1   :  { %v1551_v10 = vpop.eup %1550  ;;  %1552 = vpow2.f32 %v1140_v9 }
 0x3e2   :  { %1182 = vadd.xlane.f32.xlu2 %v1551_v10 }
 0x3e4   :  { %v1099_v30 = vpop.xlane.xlu2 %1098 }
 0x3e5   :  { %v2242_v29 = vsub.f32 %v2170_v26, %v1099_v30 }
 0x3e6   :  { %v1107_v24 = vpop.xlane.xlu0 %1106 }
 0x3e7   :  { %v2245_v13 = vsub.f32 %v2175_v27, %v1107_v24  ;;  %v1553_v14 = vpop.eup %1552  ;;  %v1146_v58 = vmul.f32 1.442695, %v2242_v29 }
 0x3e8   :  { %1172 = vadd.xlane.f32.xlu0 %v1553_v14 }
 0x3e9   :  { %v1154_v60 = vmul.f32 1.442695, %v2245_v13  ;;  %1554 = vpow2.f32 %v1146_v58 }
 0x3eb   :  { %1556 = vpow2.f32 %v1154_v60 }
 0x3ec   :  { %v1105_v15 = vpop.xlane.xlu2 %1104 }
 0x3ed   :  { %v2250_v16 = vsub.f32 %v2186_v35, %v1105_v15 }
 0x3ee   :  { %v1113_v7 = vpop.xlane.xlu0 %1112  ;;  %v1109_v0 = vpop.xlane.xlu1 %1108 }
 0x3ef   :  { %v2253_v19 = vsub.f32 %v2195_v39, %v1113_v7  ;;  %v2256_v21 = vsub.f32 %v2191_v38, %v1109_v0  ;;  %v1555_v11 = vpop.eup %1554  ;;  %v1152_v25 = vmul.f32 1.442695, %v2250_v16 }
 0x3f0   :  { %1178 = vadd.xlane.f32.xlu0 %v1555_v11 }
 0x3f1   :  { %v1557_v56 = vpop.eup %1556  ;;  %v1160_v26 = vmul.f32 1.442695, %v2253_v19  ;;  %v1156_v27 = vmul.f32 1.442695, %v2256_v21  ;;  %1558 = vpow2.f32 %v1152_v25 }
 0x3f2   :  { %1186 = vadd.xlane.f32.xlu1 %v1557_v56 }
 0x3f3   :  { %1560 = vpow2.f32 %v1160_v26 }
 0x3f4   :  { %1562 = vpow2.f32 %v1156_v27  ;;  %v1117_v54 = vpop.xlane.xlu2 %1116 }
 0x3f5   :  { %v2262_v41 = vsub.f32 %v2210_v52, %v1117_v54 }
 0x3f6   :  { %v1167_v1 = vpop.xlane.xlu0 %1166  ;;  %v1115_v28 = vpop.xlane.xlu1 %1114 }
 0x3f7   :  { %1564 = vlog2.f32 %v1167_v1  ;;  %v2265_v31 = vsub.f32 %v2215_v20, %v1115_v28  ;;  %v1559_v45 = vpop.eup %1558  ;;  %v1164_v33 = vmul.f32 1.442695, %v2262_v41 }
 0x3f8   :  { %1184 = vadd.xlane.f32.xlu0 %v1559_v45 }
 0x3f9   :  { %v1561_v35 = vpop.eup %1560  ;;  %v1162_v37 = vmul.f32 1.442695, %v2265_v31  ;;  %1566 = vpow2.f32 %v1164_v33 }
 0x3fa   :  { %v1563_v38 = vpop.eup %1562  ;;  %1192 = vadd.xlane.f32.xlu1 %v1561_v35 }
 0x3fb   :  { %1568 = vpow2.f32 %v1162_v37  ;;  %1188 = vadd.xlane.f32.xlu2 %v1563_v38 }
 0x3fc   :  { %v1171_v12 = vpop.xlane.xlu2 %1170 }
 0x3fd   :  { %v1565_v39 = vpop.eup %1564  ;;  %1570 = vlog2.f32 %v1171_v12 }
 0x3fe   :  { %v1199_v47 = vmul.f32 0.6931472, %v1565_v39  ;;  %v1169_v48 = vpop.xlane.xlu1 %1168 }
 0x3ff   :  { %1572 = vlog2.f32 %v1169_v48  ;;  %v1567_v36 = vpop.eup %1566 }
 0x400   :  { %v1230_v50 = vsub.f32 %v2178_v4, %v1199_v47  ;;  %1196 = vadd.xlane.f32.xlu0 %v1567_v36 }
 0x401   :  { %v1569_v18 = vpop.eup %1568 }
 0x402   :  { %1246 = vst [vmem:[#allocation12] sm:$0xff] %v1230_v50 }
 0x403   :  { %1194 = vadd.xlane.f32.xlu2 %v1569_v18  ;;  %v1571_v52 = vpop.eup %1570 }
 0x404   :  { %v1203_v53 = vmul.f32 0.6931472, %v1571_v52  ;;  %v1177_v20 = vpop.xlane.xlu2 %1176 }
 0x405   :  { %v1573_v4 = vpop.eup %1572  ;;  %1574 = vlog2.f32 %v1177_v20 }
 0x406   :  { %v1201_v40 = vmul.f32 0.6931472, %v1573_v4  ;;  %v1175_v2 = vpop.xlane.xlu1 %1174  ;;  %v1232_v23 = vsub.f32 %v2197_v42, %v1203_v53 }
 0x407   :  { %1576 = vlog2.f32 %v1175_v2 }
 0x408   :  { %v1231_v63 = vsub.f32 %v2202_v46, %v1201_v40  ;;  %1248 = vst [vmem:[#allocation12 + $0x10] sm:$0xff] %v1232_v23 }
 0x40a   :  { %1247 = vst [vmem:[#allocation12 + $0x8] sm:$0xff] %v1231_v63 }
 0x40b   :  { %v1575_v17 = vpop.eup %1574 }
 0x40c   :  { %v1209_v62 = vmul.f32 0.6931472, %v1575_v17 }
 0x40d   :  { %v1577_v51 = vpop.eup %1576 }
 0x40e   :  { %v1207_v3 = vmul.f32 0.6931472, %v1577_v51  ;;  %v1181_v55 = vpop.xlane.xlu1 %1180  ;;  %v1235_v44 = vsub.f32 %v2217_v32, %v1209_v62 }
 0x40f   :  { %1578 = vlog2.f32 %v1181_v55 }
 0x410   :  { %v1234_v5 = vsub.f32 %v2221_v43, %v1207_v3  ;;  %1251 = vst [vmem:[#allocation12 + $0x28] sm:$0xff] %v1235_v44 }
 0x412   :  { %1250 = vst [vmem:[#allocation12 + $0x20] sm:$0xff] %v1234_v5 }
 0x415   :  { %v1579_v34 = vpop.eup %1578 }
 0x416   :  { %v1213_v57 = vmul.f32 0.6931472, %v1579_v34 }
 0x418   :  { %v1237_v42 = vsub.f32 %v2226_v59, %v1213_v57 }
 0x41a   :  { %1253 = vst [vmem:[#allocation12 + $0x38] sm:$0xff] %v1237_v42 }
 0x453   :  { %v1191_v46 = vpop.xlane.xlu0 %1190 }
 0x454   :  { %1580 = vlog2.f32 %v1191_v46 }
 0x455   :  { %v1183_v22 = vpop.xlane.xlu2 %1182 }
 0x456   :  { %1582 = vlog2.f32 %v1183_v22 }
 0x45a   :  { %v1581_v6 = vpop.eup %1580 }
 0x45b   :  { %v1223_v10 = vmul.f32 0.6931472, %v1581_v6  ;;  %v1173_v30 = vpop.xlane.xlu0 %1172 }
 0x45c   :  { %v1583_v9 = vpop.eup %1582  ;;  %1584 = vlog2.f32 %v1173_v30 }
 0x45d   :  { %v1215_v24 = vmul.f32 0.6931472, %v1583_v9  ;;  %v1242_v32 = vsub.f32 %v2230_v61, %v1223_v10 }
 0x45f   :  { %v1238_v43 = vsub.f32 %v2233_v49, %v1215_v24  ;;  %1258 = vst [vmem:[#allocation12 + $0x60] sm:$0xff] %v1242_v32 }
 0x461   :  { %1254 = vst [vmem:[#allocation12 + $0x40] sm:$0xff] %v1238_v43 }
 0x462   :  { %v1585_v14 = vpop.eup %1584 }
 0x463   :  { %v1205_v58 = vmul.f32 0.6931472, %v1585_v14  ;;  %v1179_v59 = vpop.xlane.xlu0 %1178 }
 0x464   :  { %1586 = vlog2.f32 %v1179_v59 }
 0x465   :  { %v1187_v60 = vpop.xlane.xlu1 %1186  ;;  %v1233_v15 = vsub.f32 %v2238_v8, %v1205_v58 }
 0x466   :  { %1588 = vlog2.f32 %v1187_v60 }
 0x467   :  { %1249 = vst [vmem:[#allocation12 + $0x18] sm:$0xff] %v1233_v15 }
 0x46a   :  { %v1587_v7 = vpop.eup %1586 }
 0x46b   :  { %v1211_v11 = vmul.f32 0.6931472, %v1587_v7  ;;  %v1185_v25 = vpop.xlane.xlu0 %1184 }
 0x46c   :  { %v1589_v0 = vpop.eup %1588  ;;  %1590 = vlog2.f32 %v1185_v25 }
 0x46d   :  { %v1219_v56 = vmul.f32 0.6931472, %v1589_v0  ;;  %v1193_v61 = vpop.xlane.xlu1 %1192  ;;  %v1236_v49 = vsub.f32 %v2242_v29, %v1211_v11 }
 0x46e   :  { %v1189_v26 = vpop.xlane.xlu2 %1188  ;;  %1592 = vlog2.f32 %v1193_v61 }
 0x46f   :  { %v1240_v27 = vsub.f32 %v2245_v13, %v1219_v56  ;;  %1594 = vlog2.f32 %v1189_v26  ;;  %1252 = vst [vmem:[#allocation12 + $0x30] sm:$0xff] %v1236_v49 }
 0x471   :  { %1256 = vst [vmem:[#allocation12 + $0x50] sm:$0xff] %v1240_v27 }
 0x472   :  { %v1591_v54 = vpop.eup %1590 }
 0x473   :  { %v1217_v1 = vmul.f32 0.6931472, %v1591_v54  ;;  %v1197_v28 = vpop.xlane.xlu0 %1196 }
 0x474   :  { %v1593_v8 = vpop.eup %1592  ;;  %1596 = vlog2.f32 %v1197_v28 }
 0x475   :  { %v1595_v45 = vpop.eup %1594  ;;  %v1225_v33 = vmul.f32 0.6931472, %v1593_v8  ;;  %v1239_v35 = vsub.f32 %v2250_v16, %v1217_v1 }
 0x476   :  { %v1221_v37 = vmul.f32 0.6931472, %v1595_v45  ;;  %v1195_v38 = vpop.xlane.xlu2 %1194 }
 0x477   :  { %v1243_v29 = vsub.f32 %v2253_v19, %v1225_v33  ;;  %1598 = vlog2.f32 %v1195_v38  ;;  %1255 = vst [vmem:[#allocation12 + $0x48] sm:$0xff] %v1239_v35 }
 0x478   :  { %v1241_v13 = vsub.f32 %v2256_v21, %v1221_v37 }
 0x479   :  { %1259 = vst [vmem:[#allocation12 + $0x68] sm:$0xff] %v1243_v29 }
 0x47a   :  { %1257 = vst [vmem:[#allocation12 + $0x58] sm:$0xff] %v1241_v13  ;;  %v1597_v39 = vpop.eup %1596 }
 0x47b   :  { %v1229_v12 = vmul.f32 0.6931472, %v1597_v39 }
 0x47d   :  { %v1599_v47 = vpop.eup %1598  ;;  %v1245_v16 = vsub.f32 %v2262_v41, %v1229_v12 }
 0x47e   :  { %v1227_v48 = vmul.f32 0.6931472, %v1599_v47 }
 0x47f   :  { %1261 = vst [vmem:[#allocation12 + $0x78] sm:$0xff] %v1245_v16 }
 0x480   :  { %v1244_v19 = vsub.f32 %v2265_v31, %v1227_v48 }
 0x482   :  { %1260 = vst [vmem:[#allocation12 + $0x70] sm:$0xff] %v1244_v19 }
 0x483   :  { %1287 = dma.vmem_to_hbm [thread:$0]  %s1280_s23, 2048, %s1282_s26, [#allocation13], %s1762_s21, %s1762_s21, %s1763_s22  }
 0x484   :  { %1750 = dma.done.wait [#allocation5], 2048  }
 0x485   :  { %1751 = vsyncadd [#allocation5], 4294965248 }
 0x486   :  { %1752 = dma.done.wait [#allocation13], 2048  }
 0x487   :  { %1753 = vsyncadd [#allocation13], 4294965248 }
 0x488   :  { %1296 = vsyncpa [#allocation4], 1 }
 0x489   :  { %1297 = vsyncpa [#allocation7], 1 }
 0x48a   :  { %1298 = vsyncpa [#allocation10], 1 }
 0x48b   :  { %1299 = vsyncpa [#allocation5], 1 }
 0x48c   :  { %1300 = vsyncpa [#allocation13], 1 }

</bundles_post_ra>
